<compile_context>
chip_gen: v7x
topology: tpu7x:2x2x1
jax: 0.10.0
libtpu: 0.0.40
codegen_flags: <defaults>
</compile_context>

<pallas_src>
import math
import functools

import jax
import jax.numpy as jnp
from jax import lax
from jax.experimental import pallas as pl
from jax.experimental.pallas import tpu as pltpu


def _encoder_layer_kernel(
    # inputs
    xq_ref, xkv_ref, bias_ref,
    wqkv_ref, bqkv_ref, wo_ref, bo_ref,
    ln_g_ref, ln_b_ref, w1_ref, b1_ref, w2_ref, b2_ref,
    # outputs
    out_ref,
    # scratch
    q_scr, k_scr, v_scr, m_scr, l_scr, acc_scr,
    *, n_head: int, d_head: int, d_model: int,
):
    ki = pl.program_id(2)
    nk = pl.num_programs(2)
    scale = 1.0 / math.sqrt(d_head)

    # ---- once per (batch, q-tile): project Q from the fused QKV weight,
    # scatter to head-major scratch, reset online-softmax state -------------
    @pl.when(ki == 0)
    def _init():
        xq = xq_ref[0]                                              # (TQ, D) bf16
        q = jnp.dot(xq, wqkv_ref[:, :d_model],
                    preferred_element_type=jnp.float32) + bqkv_ref[:, :d_model]
        for h in range(n_head):                                     # layout-only
            q_scr[h] = q[:, h * d_head:(h + 1) * d_head].astype(jnp.bfloat16)
        m_scr[...] = jnp.full(m_scr.shape, -jnp.inf, m_scr.dtype)
        l_scr[...] = jnp.zeros(l_scr.shape, l_scr.dtype)
        acc_scr[...] = jnp.zeros(acc_scr.shape, acc_scr.dtype)

    # ---- per K/V tile: fused K+V projection in one MXU pass ---------------
    xk = xkv_ref[0]                                                 # (TK, D) bf16
    kv = jnp.dot(xk, wqkv_ref[:, d_model:],
                 preferred_element_type=jnp.float32) + bqkv_ref[:, d_model:]
    for h in range(n_head):                                         # layout-only
        k_scr[h] = kv[:, h * d_head:(h + 1) * d_head].astype(jnp.bfloat16)
        v_scr[h] = kv[:, d_model + h * d_head:
                      d_model + (h + 1) * d_head].astype(jnp.bfloat16)

    # ---- head-batched scores + additive mask bias + online softmax --------
    qh = q_scr[...]                                                 # (H, TQ, E)
    kh = k_scr[...]                                                 # (H, TK, E)
    vh = v_scr[...]                                                 # (H, TK, E)
    s = jnp.einsum("hqe,hke->hqk", qh, kh,
                   preferred_element_type=jnp.float32) * scale      # (H, TQ, TK)
    s = s + bias_ref[0].astype(jnp.float32)                         # 0 or -1e30

    m_prev = m_scr[...]                                             # (H, TQ, 1)
    m_new = jnp.maximum(m_prev, jnp.max(s, axis=-1, keepdims=True))
    alpha = jnp.exp(m_prev - m_new)
    p = jnp.exp(s - m_new)
    l_scr[...] = alpha * l_scr[...] + jnp.sum(p, axis=-1, keepdims=True)
    acc_scr[...] = alpha * acc_scr[...] + jnp.einsum(
        "hqk,hke->hqe", p.astype(jnp.bfloat16), vh,
        preferred_element_type=jnp.float32)
    m_scr[...] = m_new

    # ---- last K/V tile: finish attention, out-proj, pre-LN FFN, residual --
    @pl.when(ki == nk - 1)
    def _finalize():
        # softmax normalization via EUP reciprocal, merge heads back to (TQ, D)
        ctx = jnp.concatenate(
            [acc_scr[h] * pl.reciprocal(l_scr[h], approx=True)
             for h in range(n_head)],
            axis=-1)
        attn = jnp.dot(ctx.astype(jnp.bfloat16), wo_ref[...],
                       preferred_element_type=jnp.float32) + bo_ref[...]

        # PositionwiseFeedForward, normalize_before=True
        residual = attn
        mu = jnp.mean(attn, axis=-1, keepdims=True)
        var = jnp.mean((attn - mu) ** 2, axis=-1, keepdims=True)
        xn = (attn - mu) * lax.rsqrt(var + 1e-6)
        xn = xn * ln_g_ref[...] + ln_b_ref[...]

        h1 = jnp.dot(xn.astype(jnp.bfloat16), w1_ref[...],
                     preferred_element_type=jnp.float32) + b1_ref[...]
        h1 = 0.5 * h1 * (1.0 + lax.erf(h1 * (1.0 / math.sqrt(2.0))))  # exact GELU
        h2 = jnp.dot(h1.astype(jnp.bfloat16), w2_ref[...],
                     preferred_element_type=jnp.float32) + b2_ref[...]
        out_ref[0] = (h2 + residual).astype(out_ref.dtype)


def encoder_layer(x, mask_bool, params, *, n_head, tile_q=256, tile_k=256):
    """x: (B, L, D) f32, mask_bool: (B, L, L) bool (True == masked)."""
    B, L, D = x.shape
    assert D % n_head == 0
    d_head = D // n_head
    d_inner = params["w1"].shape[1]

    tq = tile_q if (L % tile_q == 0) else L
    tk = tile_k if (L % tile_k == 0) else L
    nq, nkv = L // tq, L // tk

    # bool mask -> additive bf16 bias (halves mask DMA vs f32; finite -1e30
    # keeps fully-masked rows NaN-free).
    # TODO(synk): for a purely causal mask this could be generated in-kernel
    # from broadcasted_iota and skipped from HBM entirely.
    bias = jnp.where(mask_bool, -1e30, 0.0).astype(jnp.bfloat16)

    # fused QKV weight, bf16 operands for the MXU (biases stay f32)
    wqkv = jnp.concatenate(
        [params["wq"], params["wk"], params["wv"]], axis=1).astype(jnp.bfloat16)
    bqkv = jnp.concatenate([params["bq"], params["bk"], params["bv"]], axis=1)
    wo = params["wo"].astype(jnp.bfloat16)
    w1 = params["w1"].astype(jnp.bfloat16)
    w2 = params["w2"].astype(jnp.bfloat16)
    x_bf = x.astype(jnp.bfloat16)

    def _full(shape):
        n = len(shape)
        return pl.BlockSpec(shape, lambda *_: (0,) * n)

    kernel = functools.partial(
        _encoder_layer_kernel, n_head=n_head, d_head=d_head, d_model=D)

    return pl.pallas_call(
        kernel,
        out_shape=jax.ShapeDtypeStruct((B, L, D), jnp.float32),
        grid=(B, nq, nkv),
        in_specs=[
            pl.BlockSpec((1, tq, D), lambda b, qi, ki: (b, qi, 0)),    # x (q rows)
            pl.BlockSpec((1, tk, D), lambda b, qi, ki: (b, ki, 0)),    # x (k/v rows)
            pl.BlockSpec((1, tq, tk), lambda b, qi, ki: (b, qi, ki)),  # mask bias
            _full((D, 3 * D)), _full((1, 3 * D)),                      # Wqkv, bqkv
            _full((D, D)), _full((1, D)),                              # Wo, bo
            _full((1, D)), _full((1, D)),                              # LN g, b
            _full((D, d_inner)), _full((1, d_inner)),                  # W1, b1
            _full((d_inner, D)), _full((1, D)),                        # W2, b2
        ],
        out_specs=pl.BlockSpec((1, tq, D), lambda b, qi, ki: (b, qi, 0)),
        scratch_shapes=[
            pltpu.VMEM((n_head, tq, d_head), jnp.bfloat16),   # Q, head-major
            pltpu.VMEM((n_head, tk, d_head), jnp.bfloat16),   # K tile
            pltpu.VMEM((n_head, tk, d_head), jnp.bfloat16),   # V tile
            pltpu.VMEM((n_head, tq, 1), jnp.float32),         # running max
            pltpu.VMEM((n_head, tq, 1), jnp.float32),         # running sum
            pltpu.VMEM((n_head, tq, d_head), jnp.float32),    # output accumulator
        ],
        compiler_params=pltpu.CompilerParams(
            dimension_semantics=("parallel", "parallel", "arbitrary"),
            vmem_limit_bytes=64 * 1024 * 1024,
        ),
    )(x_bf, x_bf, bias, wqkv, bqkv, wo, params["bo"],
      params["ln_g"], params["ln_b"], w1, params["b1"], w2, params["b2"])


def _reference(x, mask_bool, params, *, n_head):
    """Pure-JAX f32 reference mirroring the PyTorch forward (eval mode)."""
    B, L, D = x.shape
    E = D // n_head
    q = (x @ params["wq"] + params["bq"]).reshape(B, L, n_head, E)
    k = (x @ params["wk"] + params["bk"]).reshape(B, L, n_head, E)
    v = (x @ params["wv"] + params["bv"]).reshape(B, L, n_head, E)
    scores = jnp.einsum("blhe,bshe->bhls", q, k)
    scores = jnp.where(mask_bool[:, None, :, :], -jnp.inf, scores)
    a = jax.nn.softmax(scores / math.sqrt(E), axis=-1)
    out = jnp.einsum("bhls,bshd->blhd", a, v).reshape(B, L, D)
    out = out @ params["wo"] + params["bo"]
    resid = out
    mu = out.mean(-1, keepdims=True)
    var = ((out - mu) ** 2).mean(-1, keepdims=True)
    xn = (out - mu) / jnp.sqrt(var + 1e-6) * params["ln_g"] + params["ln_b"]
    h1 = xn @ params["w1"] + params["b1"]
    h1 = 0.5 * h1 * (1.0 + lax.erf(h1 / math.sqrt(2.0)))
    h2 = h1 @ params["w2"] + params["b2"]
    return h2 + resid


def _init_params(key, d_model, d_inner):
    ks = jax.random.split(key, 8)
    n = lambda k, shape: (0.02 * jax.random.normal(k, shape)).astype(jnp.float32)
    return dict(
        wq=n(ks[0], (d_model, d_model)), bq=jnp.zeros((1, d_model), jnp.float32),
        wk=n(ks[1], (d_model, d_model)), bk=jnp.zeros((1, d_model), jnp.float32),
        wv=n(ks[2], (d_model, d_model)), bv=jnp.zeros((1, d_model), jnp.float32),
        wo=n(ks[3], (d_model, d_model)), bo=n(ks[4], (1, d_model)),
        ln_g=jnp.ones((1, d_model), jnp.float32),
        ln_b=jnp.zeros((1, d_model), jnp.float32),
        w1=n(ks[5], (d_model, d_inner)), b1=n(ks[6], (1, d_inner)),
        w2=n(ks[7], (d_inner, d_model)), b2=jnp.zeros((1, d_model), jnp.float32),
    )


if __name__ == "__main__":
    B, L, d_model, n_head, d_inner = 2, 16, 32, 4, 64

    key = jax.random.PRNGKey(0)
    kx, kp = jax.random.split(key)
    x = jax.random.normal(kx, (B, L, d_model), dtype=jnp.float32)
    # causal mask: True == masked (j > i), same convention as TriangularCausalMask
    mask = jnp.broadcast_to(
        jnp.triu(jnp.ones((L, L), dtype=bool), k=1), (B, L, L)
    )
    params = _init_params(kp, d_model, d_inner)

    out = jax.block_until_ready(encoder_layer(x, mask, params, n_head=n_head))
    ref = _reference(x, mask, params, n_head=n_head)

    assert out.shape == (B, L, d_model)
    max_err = float(jnp.max(jnp.abs(out - ref)))
    assert jnp.allclose(out, ref, atol=5e-3, rtol=5e-2), (
        f"mismatch vs reference (max abs err {max_err})")
    print("KERNEL_OK")
</pallas_src>

<mosaic_0001>
module attributes {stable_mosaic.version = 11 : i64} {
  func.func @_encoder_layer_kernel(%arg0: i32, %arg1: i32, %arg2: i32, %arg3: memref<1x16x32xbf16, #tpu.memory_space<vmem>>, %arg4: memref<1x16x32xbf16, #tpu.memory_space<vmem>>, %arg5: memref<1x16x16xbf16, #tpu.memory_space<vmem>>, %arg6: memref<32x96xbf16, #tpu.memory_space<vmem>>, %arg7: memref<1x96xf32, #tpu.memory_space<vmem>>, %arg8: memref<32x32xbf16, #tpu.memory_space<vmem>>, %arg9: memref<1x32xf32, #tpu.memory_space<vmem>>, %arg10: memref<1x32xf32, #tpu.memory_space<vmem>>, %arg11: memref<1x32xf32, #tpu.memory_space<vmem>>, %arg12: memref<32x64xbf16, #tpu.memory_space<vmem>>, %arg13: memref<1x64xf32, #tpu.memory_space<vmem>>, %arg14: memref<64x32xbf16, #tpu.memory_space<vmem>>, %arg15: memref<1x32xf32, #tpu.memory_space<vmem>>, %arg16: memref<1x16x32xf32, #tpu.memory_space<vmem>>, %arg17: memref<4x16x8xbf16, #tpu.memory_space<vmem>>, %arg18: memref<4x16x8xbf16, #tpu.memory_space<vmem>>, %arg19: memref<4x16x8xbf16, #tpu.memory_space<vmem>>, %arg20: memref<4x16x1xf32, #tpu.memory_space<vmem>>, %arg21: memref<4x16x1xf32, #tpu.memory_space<vmem>>, %arg22: memref<4x16x8xf32, #tpu.memory_space<vmem>>) attributes {dimension_semantics = [#tpu.dimension_semantics<parallel>, #tpu.dimension_semantics<parallel>, #tpu.dimension_semantics<arbitrary>], iteration_bounds = array<i64: 2, 1, 1>, scalar_prefetch = 0 : i64, scratch_operands = 6 : i64, tpu.core_type = #tpu.core_type<tc>, window_params = [{transform_indices = @transform_0, window_bounds = array<i64: 1, 16, 32>}, {transform_indices = @transform_1, window_bounds = array<i64: 1, 16, 32>}, {transform_indices = @transform_2, window_bounds = array<i64: 1, 16, 16>}, {pipeline_mode = #tpu.pipeline_mode<synchronous>, transform_indices = @transform_3, window_bounds = array<i64: 32, 96>}, {pipeline_mode = #tpu.pipeline_mode<synchronous>, transform_indices = @transform_4, window_bounds = array<i64: 1, 96>}, {pipeline_mode = #tpu.pipeline_mode<synchronous>, transform_indices = @transform_5, window_bounds = array<i64: 32, 32>}, {pipeline_mode = #tpu.pipeline_mode<synchronous>, transform_indices = @transform_6, window_bounds = array<i64: 1, 32>}, {pipeline_mode = #tpu.pipeline_mode<synchronous>, transform_indices = @transform_7, window_bounds = array<i64: 1, 32>}, {pipeline_mode = #tpu.pipeline_mode<synchronous>, transform_indices = @transform_8, window_bounds = array<i64: 1, 32>}, {pipeline_mode = #tpu.pipeline_mode<synchronous>, transform_indices = @transform_9, window_bounds = array<i64: 32, 64>}, {pipeline_mode = #tpu.pipeline_mode<synchronous>, transform_indices = @transform_10, window_bounds = array<i64: 1, 64>}, {pipeline_mode = #tpu.pipeline_mode<synchronous>, transform_indices = @transform_11, window_bounds = array<i64: 64, 32>}, {pipeline_mode = #tpu.pipeline_mode<synchronous>, transform_indices = @transform_12, window_bounds = array<i64: 1, 32>}, {transform_indices = @transform_13, window_bounds = array<i64: 1, 16, 32>}]} {
    %c0_i32 = arith.constant 0 : i32
    %0 = arith.cmpi eq, %arg2, %c0_i32 : i32
    %1 = arith.extui %0 : i1 to i32
    %c0_i32_0 = arith.constant 0 : i32
    %2 = arith.cmpi ne, %1, %c0_i32_0 : i32
    scf.if %2 {
      %c0_64 = arith.constant 0 : index
      %c0_65 = arith.constant 0 : index
      %c0_66 = arith.constant 0 : index
      %88 = vector.load %arg3[%c0_64, %c0_65, %c0_66] : memref<1x16x32xbf16, #tpu.memory_space<vmem>>, vector<1x16x32xbf16>
      %89 = vector.shape_cast %88 : vector<1x16x32xbf16> to vector<16x32xbf16>
      %c0_67 = arith.constant 0 : index
      %c0_68 = arith.constant 0 : index
      %90 = vector.load %arg6[%c0_67, %c0_68] : memref<32x96xbf16, #tpu.memory_space<vmem>>, vector<32x32xbf16>
      %cst_69 = arith.constant dense<0.000000e+00> : vector<16x32xf32>
      %91 = tpu.matmul %89, %90, %cst_69 {dimension_numbers = #tpu.dot_dimension_numbers<[1], [0], [0], [1], [0, 0, 1, 1], [], []>} : vector<16x32xbf16>, vector<32x32xbf16>, vector<16x32xf32> -> vector<16x32xf32>
      %c0_70 = arith.constant 0 : index
      %c0_71 = arith.constant 0 : index
      %92 = vector.load %arg7[%c0_70, %c0_71] : memref<1x96xf32, #tpu.memory_space<vmem>>, vector<1x32xf32>
      %93 = vector.broadcast %92 : vector<1x32xf32> to vector<16x32xf32>
      %94 = arith.addf %91, %93 : vector<16x32xf32>
      %95 = vector.extract_strided_slice %94 {offsets = [0, 0], sizes = [16, 8], strides = [1, 1]} : vector<16x32xf32> to vector<16x8xf32>
      %96 = arith.truncf %95 : vector<16x8xf32> to vector<16x8xbf16>
      %c0_72 = arith.constant 0 : index
      %c0_73 = arith.constant 0 : index
      %c0_74 = arith.constant 0 : index
      %97 = vector.load %arg17[%c0_72, %c0_73, %c0_74] : memref<4x16x8xbf16, #tpu.memory_space<vmem>>, vector<1x16x8xbf16>
      %98 = vector.shape_cast %97 : vector<1x16x8xbf16> to vector<16x8xbf16>
      %99 = vector.shape_cast %96 : vector<16x8xbf16> to vector<1x16x8xbf16>
      tpu.vector_store %arg17[%c0_72, %c0_73, %c0_74], %99 {strides = array<i32>} : memref<4x16x8xbf16, #tpu.memory_space<vmem>>, vector<1x16x8xbf16>,
      %100 = vector.extract_strided_slice %94 {offsets = [0, 8], sizes = [16, 8], strides = [1, 1]} : vector<16x32xf32> to vector<16x8xf32>
      %101 = arith.truncf %100 : vector<16x8xf32> to vector<16x8xbf16>
      %c1_75 = arith.constant 1 : index
      %c0_76 = arith.constant 0 : index
      %c0_77 = arith.constant 0 : index
      %102 = vector.load %arg17[%c1_75, %c0_76, %c0_77] : memref<4x16x8xbf16, #tpu.memory_space<vmem>>, vector<1x16x8xbf16>
      %103 = vector.shape_cast %102 : vector<1x16x8xbf16> to vector<16x8xbf16>
      %104 = vector.shape_cast %101 : vector<16x8xbf16> to vector<1x16x8xbf16>
      tpu.vector_store %arg17[%c1_75, %c0_76, %c0_77], %104 {strides = array<i32>} : memref<4x16x8xbf16, #tpu.memory_space<vmem>>, vector<1x16x8xbf16>,
      %105 = vector.extract_strided_slice %94 {offsets = [0, 16], sizes = [16, 8], strides = [1, 1]} : vector<16x32xf32> to vector<16x8xf32>
      %106 = arith.truncf %105 : vector<16x8xf32> to vector<16x8xbf16>
      %c2_78 = arith.constant 2 : index
      %c0_79 = arith.constant 0 : index
      %c0_80 = arith.constant 0 : index
      %107 = vector.load %arg17[%c2_78, %c0_79, %c0_80] : memref<4x16x8xbf16, #tpu.memory_space<vmem>>, vector<1x16x8xbf16>
      %108 = vector.shape_cast %107 : vector<1x16x8xbf16> to vector<16x8xbf16>
      %109 = vector.shape_cast %106 : vector<16x8xbf16> to vector<1x16x8xbf16>
      tpu.vector_store %arg17[%c2_78, %c0_79, %c0_80], %109 {strides = array<i32>} : memref<4x16x8xbf16, #tpu.memory_space<vmem>>, vector<1x16x8xbf16>,
      %110 = vector.extract_strided_slice %94 {offsets = [0, 24], sizes = [16, 8], strides = [1, 1]} : vector<16x32xf32> to vector<16x8xf32>
      %111 = arith.truncf %110 : vector<16x8xf32> to vector<16x8xbf16>
      %c3_81 = arith.constant 3 : index
      %c0_82 = arith.constant 0 : index
      %c0_83 = arith.constant 0 : index
      %112 = vector.load %arg17[%c3_81, %c0_82, %c0_83] : memref<4x16x8xbf16, #tpu.memory_space<vmem>>, vector<1x16x8xbf16>
      %113 = vector.shape_cast %112 : vector<1x16x8xbf16> to vector<16x8xbf16>
      %114 = vector.shape_cast %111 : vector<16x8xbf16> to vector<1x16x8xbf16>
      tpu.vector_store %arg17[%c3_81, %c0_82, %c0_83], %114 {strides = array<i32>} : memref<4x16x8xbf16, #tpu.memory_space<vmem>>, vector<1x16x8xbf16>,
      %cst_84 = arith.constant 0xFF800000 : f32
      %115 = vector.broadcast %cst_84 : f32 to vector<4x16x1xf32>
      %c0_85 = arith.constant 0 : index
      %c0_86 = arith.constant 0 : index
      %c0_87 = arith.constant 0 : index
      %116 = vector.load %arg20[%c0_85, %c0_86, %c0_87] : memref<4x16x1xf32, #tpu.memory_space<vmem>>, vector<4x16x1xf32>
      tpu.vector_store %arg20[%c0_85, %c0_86, %c0_87], %115 {strides = array<i32>} : memref<4x16x1xf32, #tpu.memory_space<vmem>>, vector<4x16x1xf32>,
      %cst_88 = arith.constant 0.000000e+00 : f32
      %117 = vector.broadcast %cst_88 : f32 to vector<4x16x1xf32>
      %c0_89 = arith.constant 0 : index
      %c0_90 = arith.constant 0 : index
      %c0_91 = arith.constant 0 : index
      %118 = vector.load %arg21[%c0_89, %c0_90, %c0_91] : memref<4x16x1xf32, #tpu.memory_space<vmem>>, vector<4x16x1xf32>
      tpu.vector_store %arg21[%c0_89, %c0_90, %c0_91], %117 {strides = array<i32>} : memref<4x16x1xf32, #tpu.memory_space<vmem>>, vector<4x16x1xf32>,
      %cst_92 = arith.constant 0.000000e+00 : f32
      %119 = vector.broadcast %cst_92 : f32 to vector<4x16x8xf32>
      %c0_93 = arith.constant 0 : index
      %c0_94 = arith.constant 0 : index
      %c0_95 = arith.constant 0 : index
      %120 = vector.load %arg22[%c0_93, %c0_94, %c0_95] : memref<4x16x8xf32, #tpu.memory_space<vmem>>, vector<4x16x8xf32>
      tpu.vector_store %arg22[%c0_93, %c0_94, %c0_95], %119 {strides = array<i32>} : memref<4x16x8xf32, #tpu.memory_space<vmem>>, vector<4x16x8xf32>,
    } else {
    }
    %c0 = arith.constant 0 : index
    %c0_1 = arith.constant 0 : index
    %c0_2 = arith.constant 0 : index
    %3 = vector.load %arg4[%c0, %c0_1, %c0_2] : memref<1x16x32xbf16, #tpu.memory_space<vmem>>, vector<1x16x32xbf16>
    %4 = vector.shape_cast %3 : vector<1x16x32xbf16> to vector<16x32xbf16>
    %c0_3 = arith.constant 0 : index
    %c32 = arith.constant 32 : index
    %5 = vector.load %arg6[%c0_3, %c32] : memref<32x96xbf16, #tpu.memory_space<vmem>>, vector<32x64xbf16>
    %cst = arith.constant dense<0.000000e+00> : vector<16x64xf32>
    %6 = tpu.matmul %4, %5, %cst {dimension_numbers = #tpu.dot_dimension_numbers<[1], [0], [0], [1], [0, 0, 1, 1], [], []>} : vector<16x32xbf16>, vector<32x64xbf16>, vector<16x64xf32> -> vector<16x64xf32>
    %c0_4 = arith.constant 0 : index
    %c32_5 = arith.constant 32 : index
    %7 = vector.load %arg7[%c0_4, %c32_5] : memref<1x96xf32, #tpu.memory_space<vmem>>, vector<1x64xf32>
    %8 = vector.broadcast %7 : vector<1x64xf32> to vector<16x64xf32>
    %9 = arith.addf %6, %8 : vector<16x64xf32>
    %10 = vector.extract_strided_slice %9 {offsets = [0, 0], sizes = [16, 8], strides = [1, 1]} : vector<16x64xf32> to vector<16x8xf32>
    %11 = arith.truncf %10 : vector<16x8xf32> to vector<16x8xbf16>
    %c0_6 = arith.constant 0 : index
    %c0_7 = arith.constant 0 : index
    %c0_8 = arith.constant 0 : index
    %12 = vector.load %arg18[%c0_6, %c0_7, %c0_8] : memref<4x16x8xbf16, #tpu.memory_space<vmem>>, vector<1x16x8xbf16>
    %13 = vector.shape_cast %12 : vector<1x16x8xbf16> to vector<16x8xbf16>
    %14 = vector.shape_cast %11 : vector<16x8xbf16> to vector<1x16x8xbf16>
    tpu.vector_store %arg18[%c0_6, %c0_7, %c0_8], %14 {strides = array<i32>} : memref<4x16x8xbf16, #tpu.memory_space<vmem>>, vector<1x16x8xbf16>,
    %15 = vector.extract_strided_slice %9 {offsets = [0, 32], sizes = [16, 8], strides = [1, 1]} : vector<16x64xf32> to vector<16x8xf32>
    %16 = arith.truncf %15 : vector<16x8xf32> to vector<16x8xbf16>
    %c0_9 = arith.constant 0 : index
    %c0_10 = arith.constant 0 : index
    %c0_11 = arith.constant 0 : index
    %17 = vector.load %arg19[%c0_9, %c0_10, %c0_11] : memref<4x16x8xbf16, #tpu.memory_space<vmem>>, vector<1x16x8xbf16>
    %18 = vector.shape_cast %17 : vector<1x16x8xbf16> to vector<16x8xbf16>
    %19 = vector.shape_cast %16 : vector<16x8xbf16> to vector<1x16x8xbf16>
    tpu.vector_store %arg19[%c0_9, %c0_10, %c0_11], %19 {strides = array<i32>} : memref<4x16x8xbf16, #tpu.memory_space<vmem>>, vector<1x16x8xbf16>,
    %20 = vector.extract_strided_slice %9 {offsets = [0, 8], sizes = [16, 8], strides = [1, 1]} : vector<16x64xf32> to vector<16x8xf32>
    %21 = arith.truncf %20 : vector<16x8xf32> to vector<16x8xbf16>
    %c1 = arith.constant 1 : index
    %c0_12 = arith.constant 0 : index
    %c0_13 = arith.constant 0 : index
    %22 = vector.load %arg18[%c1, %c0_12, %c0_13] : memref<4x16x8xbf16, #tpu.memory_space<vmem>>, vector<1x16x8xbf16>
    %23 = vector.shape_cast %22 : vector<1x16x8xbf16> to vector<16x8xbf16>
    %24 = vector.shape_cast %21 : vector<16x8xbf16> to vector<1x16x8xbf16>
    tpu.vector_store %arg18[%c1, %c0_12, %c0_13], %24 {strides = array<i32>} : memref<4x16x8xbf16, #tpu.memory_space<vmem>>, vector<1x16x8xbf16>,
    %25 = vector.extract_strided_slice %9 {offsets = [0, 40], sizes = [16, 8], strides = [1, 1]} : vector<16x64xf32> to vector<16x8xf32>
    %26 = arith.truncf %25 : vector<16x8xf32> to vector<16x8xbf16>
    %c1_14 = arith.constant 1 : index
    %c0_15 = arith.constant 0 : index
    %c0_16 = arith.constant 0 : index
    %27 = vector.load %arg19[%c1_14, %c0_15, %c0_16] : memref<4x16x8xbf16, #tpu.memory_space<vmem>>, vector<1x16x8xbf16>
    %28 = vector.shape_cast %27 : vector<1x16x8xbf16> to vector<16x8xbf16>
    %29 = vector.shape_cast %26 : vector<16x8xbf16> to vector<1x16x8xbf16>
    tpu.vector_store %arg19[%c1_14, %c0_15, %c0_16], %29 {strides = array<i32>} : memref<4x16x8xbf16, #tpu.memory_space<vmem>>, vector<1x16x8xbf16>,
    %30 = vector.extract_strided_slice %9 {offsets = [0, 16], sizes = [16, 8], strides = [1, 1]} : vector<16x64xf32> to vector<16x8xf32>
    %31 = arith.truncf %30 : vector<16x8xf32> to vector<16x8xbf16>
    %c2 = arith.constant 2 : index
    %c0_17 = arith.constant 0 : index
    %c0_18 = arith.constant 0 : index
    %32 = vector.load %arg18[%c2, %c0_17, %c0_18] : memref<4x16x8xbf16, #tpu.memory_space<vmem>>, vector<1x16x8xbf16>
    %33 = vector.shape_cast %32 : vector<1x16x8xbf16> to vector<16x8xbf16>
    %34 = vector.shape_cast %31 : vector<16x8xbf16> to vector<1x16x8xbf16>
    tpu.vector_store %arg18[%c2, %c0_17, %c0_18], %34 {strides = array<i32>} : memref<4x16x8xbf16, #tpu.memory_space<vmem>>, vector<1x16x8xbf16>,
    %35 = vector.extract_strided_slice %9 {offsets = [0, 48], sizes = [16, 8], strides = [1, 1]} : vector<16x64xf32> to vector<16x8xf32>
    %36 = arith.truncf %35 : vector<16x8xf32> to vector<16x8xbf16>
    %c2_19 = arith.constant 2 : index
    %c0_20 = arith.constant 0 : index
    %c0_21 = arith.constant 0 : index
    %37 = vector.load %arg19[%c2_19, %c0_20, %c0_21] : memref<4x16x8xbf16, #tpu.memory_space<vmem>>, vector<1x16x8xbf16>
    %38 = vector.shape_cast %37 : vector<1x16x8xbf16> to vector<16x8xbf16>
    %39 = vector.shape_cast %36 : vector<16x8xbf16> to vector<1x16x8xbf16>
    tpu.vector_store %arg19[%c2_19, %c0_20, %c0_21], %39 {strides = array<i32>} : memref<4x16x8xbf16, #tpu.memory_space<vmem>>, vector<1x16x8xbf16>,
    %40 = vector.extract_strided_slice %9 {offsets = [0, 24], sizes = [16, 8], strides = [1, 1]} : vector<16x64xf32> to vector<16x8xf32>
    %41 = arith.truncf %40 : vector<16x8xf32> to vector<16x8xbf16>
    %c3 = arith.constant 3 : index
    %c0_22 = arith.constant 0 : index
    %c0_23 = arith.constant 0 : index
    %42 = vector.load %arg18[%c3, %c0_22, %c0_23] : memref<4x16x8xbf16, #tpu.memory_space<vmem>>, vector<1x16x8xbf16>
    %43 = vector.shape_cast %42 : vector<1x16x8xbf16> to vector<16x8xbf16>
    %44 = vector.shape_cast %41 : vector<16x8xbf16> to vector<1x16x8xbf16>
    tpu.vector_store %arg18[%c3, %c0_22, %c0_23], %44 {strides = array<i32>} : memref<4x16x8xbf16, #tpu.memory_space<vmem>>, vector<1x16x8xbf16>,
    %45 = vector.extract_strided_slice %9 {offsets = [0, 56], sizes = [16, 8], strides = [1, 1]} : vector<16x64xf32> to vector<16x8xf32>
    %46 = arith.truncf %45 : vector<16x8xf32> to vector<16x8xbf16>
    %c3_24 = arith.constant 3 : index
    %c0_25 = arith.constant 0 : index
    %c0_26 = arith.constant 0 : index
    %47 = vector.load %arg19[%c3_24, %c0_25, %c0_26] : memref<4x16x8xbf16, #tpu.memory_space<vmem>>, vector<1x16x8xbf16>
    %48 = vector.shape_cast %47 : vector<1x16x8xbf16> to vector<16x8xbf16>
    %49 = vector.shape_cast %46 : vector<16x8xbf16> to vector<1x16x8xbf16>
    tpu.vector_store %arg19[%c3_24, %c0_25, %c0_26], %49 {strides = array<i32>} : memref<4x16x8xbf16, #tpu.memory_space<vmem>>, vector<1x16x8xbf16>,
    %c0_27 = arith.constant 0 : index
    %c0_28 = arith.constant 0 : index
    %c0_29 = arith.constant 0 : index
    %50 = vector.load %arg17[%c0_27, %c0_28, %c0_29] : memref<4x16x8xbf16, #tpu.memory_space<vmem>>, vector<4x16x8xbf16>
    %c0_30 = arith.constant 0 : index
    %c0_31 = arith.constant 0 : index
    %c0_32 = arith.constant 0 : index
    %51 = vector.load %arg18[%c0_30, %c0_31, %c0_32] : memref<4x16x8xbf16, #tpu.memory_space<vmem>>, vector<4x16x8xbf16>
    %c0_33 = arith.constant 0 : index
    %c0_34 = arith.constant 0 : index
    %c0_35 = arith.constant 0 : index
    %52 = vector.load %arg19[%c0_33, %c0_34, %c0_35] : memref<4x16x8xbf16, #tpu.memory_space<vmem>>, vector<4x16x8xbf16>
    "tpu.trace_start"() <{level = 10 : i32, message = "hqe,hke->hqk"}> : () -> ()
    %cst_36 = arith.constant dense<0.000000e+00> : vector<4x16x16xf32>
    %53 = tpu.matmul %50, %51, %cst_36 {dimension_numbers = #tpu.dot_dimension_numbers<[2], [2], [1], [1], [0, 0, 0, 1, 1, 1], [0], [0]>} : vector<4x16x8xbf16>, vector<4x16x8xbf16>, vector<4x16x16xf32> -> vector<4x16x16xf32>
    "tpu.trace_stop"() : () -> ()
    %cst_37 = arith.constant 0.353553385 : f32
    %54 = vector.broadcast %cst_37 : f32 to vector<4x16x16xf32>
    %55 = arith.mulf %53, %54 : vector<4x16x16xf32>
    %c0_38 = arith.constant 0 : index
    %c0_39 = arith.constant 0 : index
    %c0_40 = arith.constant 0 : index
    %56 = vector.load %arg5[%c0_38, %c0_39, %c0_40] : memref<1x16x16xbf16, #tpu.memory_space<vmem>>, vector<1x16x16xbf16>
    %57 = vector.shape_cast %56 : vector<1x16x16xbf16> to vector<16x16xbf16>
    %58 = arith.extf %57 : vector<16x16xbf16> to vector<16x16xf32>
    %59 = vector.shape_cast %58 : vector<16x16xf32> to vector<1x16x16xf32>
    %60 = vector.broadcast %59 : vector<1x16x16xf32> to vector<4x16x16xf32>
    %61 = arith.addf %55, %60 : vector<4x16x16xf32>
    %c0_41 = arith.constant 0 : index
    %c0_42 = arith.constant 0 : index
    %c0_43 = arith.constant 0 : index
    %62 = vector.load %arg20[%c0_41, %c0_42, %c0_43] : memref<4x16x1xf32, #tpu.memory_space<vmem>>, vector<4x16x1xf32>
    %cst_44 = arith.constant dense<0xFF800000> : vector<4x16xf32>
    %63 = vector.multi_reduction <maximumf>, %61, %cst_44 [2] : vector<4x16x16xf32> to vector<4x16xf32>
    %64 = vector.shape_cast %63 : vector<4x16xf32> to vector<4x16x1xf32>
    %65 = arith.maximumf %62, %64 : vector<4x16x1xf32>
    %66 = arith.subf %62, %65 : vector<4x16x1xf32>
    %67 = math.exp %66 : vector<4x16x1xf32>
    %68 = vector.broadcast %65 : vector<4x16x1xf32> to vector<4x16x16xf32>
    %69 = arith.subf %61, %68 : vector<4x16x16xf32>
    %70 = math.exp %69 : vector<4x16x16xf32>
    %c0_45 = arith.constant 0 : index
    %c0_46 = arith.constant 0 : index
    %c0_47 = arith.constant 0 : index
    %71 = vector.load %arg21[%c0_45, %c0_46, %c0_47] : memref<4x16x1xf32, #tpu.memory_space<vmem>>, vector<4x16x1xf32>
    %72 = arith.mulf %67, %71 : vector<4x16x1xf32>
    %cst_48 = arith.constant dense<0.000000e+00> : vector<4x16xf32>
    %73 = vector.multi_reduction <add>, %70, %cst_48 [2] : vector<4x16x16xf32> to vector<4x16xf32>
    %74 = vector.shape_cast %73 : vector<4x16xf32> to vector<4x16x1xf32>
    %75 = arith.addf %72, %74 : vector<4x16x1xf32>
    %c0_49 = arith.constant 0 : index
    %c0_50 = arith.constant 0 : index
    %c0_51 = arith.constant 0 : index
    %76 = vector.load %arg21[%c0_49, %c0_50, %c0_51] : memref<4x16x1xf32, #tpu.memory_space<vmem>>, vector<4x16x1xf32>
    tpu.vector_store %arg21[%c0_49, %c0_50, %c0_51], %75 {strides = array<i32>} : memref<4x16x1xf32, #tpu.memory_space<vmem>>, vector<4x16x1xf32>,
    %c0_52 = arith.constant 0 : index
    %c0_53 = arith.constant 0 : index
    %c0_54 = arith.constant 0 : index
    %77 = vector.load %arg22[%c0_52, %c0_53, %c0_54] : memref<4x16x8xf32, #tpu.memory_space<vmem>>, vector<4x16x8xf32>
    %78 = vector.broadcast %67 : vector<4x16x1xf32> to vector<4x16x8xf32>
    %79 = arith.mulf %78, %77 : vector<4x16x8xf32>
    %80 = arith.truncf %70 : vector<4x16x16xf32> to vector<4x16x16xbf16>
    "tpu.trace_start"() <{level = 10 : i32, message = "hqk,hke->hqe"}> : () -> ()
    %cst_55 = arith.constant dense<0.000000e+00> : vector<4x16x8xf32>
    %81 = tpu.matmul %80, %52, %cst_55 {dimension_numbers = #tpu.dot_dimension_numbers<[2], [1], [1], [2], [0, 0, 0, 1, 1, 2], [0], [0]>} : vector<4x16x16xbf16>, vector<4x16x8xbf16>, vector<4x16x8xf32> -> vector<4x16x8xf32>
    "tpu.trace_stop"() : () -> ()
    %82 = arith.addf %79, %81 : vector<4x16x8xf32>
    %c0_56 = arith.constant 0 : index
    %c0_57 = arith.constant 0 : index
    %c0_58 = arith.constant 0 : index
    %83 = vector.load %arg22[%c0_56, %c0_57, %c0_58] : memref<4x16x8xf32, #tpu.memory_space<vmem>>, vector<4x16x8xf32>
    tpu.vector_store %arg22[%c0_56, %c0_57, %c0_58], %82 {strides = array<i32>} : memref<4x16x8xf32, #tpu.memory_space<vmem>>, vector<4x16x8xf32>,
    %c0_59 = arith.constant 0 : index
    %c0_60 = arith.constant 0 : index
    %c0_61 = arith.constant 0 : index
    %84 = vector.load %arg20[%c0_59, %c0_60, %c0_61] : memref<4x16x1xf32, #tpu.memory_space<vmem>>, vector<4x16x1xf32>
    tpu.vector_store %arg20[%c0_59, %c0_60, %c0_61], %65 {strides = array<i32>} : memref<4x16x1xf32, #tpu.memory_space<vmem>>, vector<4x16x1xf32>,
    %c0_i32_62 = arith.constant 0 : i32
    %85 = arith.cmpi eq, %arg2, %c0_i32_62 : i32
    %86 = arith.extui %85 : i1 to i32
    %c0_i32_63 = arith.constant 0 : i32
    %87 = arith.cmpi ne, %86, %c0_i32_63 : i32
    scf.if %87 {
      %c0_64 = arith.constant 0 : index
      %c0_65 = arith.constant 0 : index
      %c0_66 = arith.constant 0 : index
      %88 = vector.load %arg22[%c0_64, %c0_65, %c0_66] : memref<4x16x8xf32, #tpu.memory_space<vmem>>, vector<1x16x8xf32>
      %89 = vector.shape_cast %88 : vector<1x16x8xf32> to vector<16x8xf32>
      %c0_67 = arith.constant 0 : index
      %c0_68 = arith.constant 0 : index
      %c0_69 = arith.constant 0 : index
      %90 = vector.load %arg21[%c0_67, %c0_68, %c0_69] : memref<4x16x1xf32, #tpu.memory_space<vmem>>, vector<1x16x1xf32>
      %91 = vector.shape_cast %90 : vector<1x16x1xf32> to vector<16x1xf32>
      %92 = tpu.reciprocal %91 {approx = true} : vector<16x1xf32> -> vector<16x1xf32>
      %93 = vector.broadcast %92 : vector<16x1xf32> to vector<16x8xf32>
      %94 = arith.mulf %89, %93 : vector<16x8xf32>
      %c1_70 = arith.constant 1 : index
      %c0_71 = arith.constant 0 : index
      %c0_72 = arith.constant 0 : index
      %95 = vector.load %arg22[%c1_70, %c0_71, %c0_72] : memref<4x16x8xf32, #tpu.memory_space<vmem>>, vector<1x16x8xf32>
      %96 = vector.shape_cast %95 : vector<1x16x8xf32> to vector<16x8xf32>
      %c1_73 = arith.constant 1 : index
      %c0_74 = arith.constant 0 : index
      %c0_75 = arith.constant 0 : index
      %97 = vector.load %arg21[%c1_73, %c0_74, %c0_75] : memref<4x16x1xf32, #tpu.memory_space<vmem>>, vector<1x16x1xf32>
      %98 = vector.shape_cast %97 : vector<1x16x1xf32> to vector<16x1xf32>
      %99 = tpu.reciprocal %98 {approx = true} : vector<16x1xf32> -> vector<16x1xf32>
      %100 = vector.broadcast %99 : vector<16x1xf32> to vector<16x8xf32>
      %101 = arith.mulf %96, %100 : vector<16x8xf32>
      %c2_76 = arith.constant 2 : index
      %c0_77 = arith.constant 0 : index
      %c0_78 = arith.constant 0 : index
      %102 = vector.load %arg22[%c2_76, %c0_77, %c0_78] : memref<4x16x8xf32, #tpu.memory_space<vmem>>, vector<1x16x8xf32>
      %103 = vector.shape_cast %102 : vector<1x16x8xf32> to vector<16x8xf32>
      %c2_79 = arith.constant 2 : index
      %c0_80 = arith.constant 0 : index
      %c0_81 = arith.constant 0 : index
      %104 = vector.load %arg21[%c2_79, %c0_80, %c0_81] : memref<4x16x1xf32, #tpu.memory_space<vmem>>, vector<1x16x1xf32>
      %105 = vector.shape_cast %104 : vector<1x16x1xf32> to vector<16x1xf32>
      %106 = tpu.reciprocal %105 {approx = true} : vector<16x1xf32> -> vector<16x1xf32>
      %107 = vector.broadcast %106 : vector<16x1xf32> to vector<16x8xf32>
      %108 = arith.mulf %103, %107 : vector<16x8xf32>
      %c3_82 = arith.constant 3 : index
      %c0_83 = arith.constant 0 : index
      %c0_84 = arith.constant 0 : index
      %109 = vector.load %arg22[%c3_82, %c0_83, %c0_84] : memref<4x16x8xf32, #tpu.memory_space<vmem>>, vector<1x16x8xf32>
      %110 = vector.shape_cast %109 : vector<1x16x8xf32> to vector<16x8xf32>
      %c3_85 = arith.constant 3 : index
      %c0_86 = arith.constant 0 : index
      %c0_87 = arith.constant 0 : index
      %111 = vector.load %arg21[%c3_85, %c0_86, %c0_87] : memref<4x16x1xf32, #tpu.memory_space<vmem>>, vector<1x16x1xf32>
      %112 = vector.shape_cast %111 : vector<1x16x1xf32> to vector<16x1xf32>
      %113 = tpu.reciprocal %112 {approx = true} : vector<16x1xf32> -> vector<16x1xf32>
      %114 = vector.broadcast %113 : vector<16x1xf32> to vector<16x8xf32>
      %115 = arith.mulf %110, %114 : vector<16x8xf32>
      %116 = tpu.concatenate %94, %101, %108, %115 in 1 : vector<16x8xf32>, vector<16x8xf32>, vector<16x8xf32>, vector<16x8xf32> -> vector<16x32xf32>
      %117 = arith.truncf %116 : vector<16x32xf32> to vector<16x32xbf16>
      %c0_88 = arith.constant 0 : index
      %c0_89 = arith.constant 0 : index
      %118 = vector.load %arg8[%c0_88, %c0_89] : memref<32x32xbf16, #tpu.memory_space<vmem>>, vector<32x32xbf16>
      %cst_90 = arith.constant dense<0.000000e+00> : vector<16x32xf32>
      %119 = tpu.matmul %117, %118, %cst_90 {dimension_numbers = #tpu.dot_dimension_numbers<[1], [0], [0], [1], [0, 0, 1, 1], [], []>} : vector<16x32xbf16>, vector<32x32xbf16>, vector<16x32xf32> -> vector<16x32xf32>
      %c0_91 = arith.constant 0 : index
      %c0_92 = arith.constant 0 : index
      %120 = vector.load %arg9[%c0_91, %c0_92] : memref<1x32xf32, #tpu.memory_space<vmem>>, vector<1x32xf32>
      %121 = vector.broadcast %120 : vector<1x32xf32> to vector<16x32xf32>
      %122 = arith.addf %119, %121 : vector<16x32xf32>
      %cst_93 = arith.constant dense<0.000000e+00> : vector<16xf32>
      %123 = vector.multi_reduction <add>, %122, %cst_93 [1] : vector<16x32xf32> to vector<16xf32>
      %124 = vector.shape_cast %123 : vector<16xf32> to vector<16x1xf32>
      %cst_94 = arith.constant 3.200000e+01 : f32
      %125 = vector.broadcast %cst_94 : f32 to vector<16x1xf32>
      %126 = arith.divf %124, %125 : vector<16x1xf32>
      %127 = vector.broadcast %126 : vector<16x1xf32> to vector<16x32xf32>
      %128 = arith.subf %122, %127 : vector<16x32xf32>
      %129 = arith.mulf %128, %128 : vector<16x32xf32>
      %cst_95 = arith.constant dense<0.000000e+00> : vector<16xf32>
      %130 = vector.multi_reduction <add>, %129, %cst_95 [1] : vector<16x32xf32> to vector<16xf32>
      %131 = vector.shape_cast %130 : vector<16xf32> to vector<16x1xf32>
      %cst_96 = arith.constant 3.200000e+01 : f32
      %132 = vector.broadcast %cst_96 : f32 to vector<16x1xf32>
      %133 = arith.divf %131, %132 : vector<16x1xf32>
      %134 = vector.broadcast %126 : vector<16x1xf32> to vector<16x32xf32>
      %135 = arith.subf %122, %134 : vector<16x32xf32>
      %cst_97 = arith.constant 9.99999997E-7 : f32
      %136 = vector.broadcast %cst_97 : f32 to vector<16x1xf32>
      %137 = arith.addf %133, %136 : vector<16x1xf32>
      %138 = math.rsqrt %137 : vector<16x1xf32>
      %139 = vector.broadcast %138 : vector<16x1xf32> to vector<16x32xf32>
      %140 = arith.mulf %135, %139 : vector<16x32xf32>
      %c0_98 = arith.constant 0 : index
      %c0_99 = arith.constant 0 : index
      %141 = vector.load %arg10[%c0_98, %c0_99] : memref<1x32xf32, #tpu.memory_space<vmem>>, vector<1x32xf32>
      %142 = vector.broadcast %141 : vector<1x32xf32> to vector<16x32xf32>
      %143 = arith.mulf %140, %142 : vector<16x32xf32>
      %c0_100 = arith.constant 0 : index
      %c0_101 = arith.constant 0 : index
      %144 = vector.load %arg11[%c0_100, %c0_101] : memref<1x32xf32, #tpu.memory_space<vmem>>, vector<1x32xf32>
      %145 = vector.broadcast %144 : vector<1x32xf32> to vector<16x32xf32>
      %146 = arith.addf %143, %145 : vector<16x32xf32>
      %147 = arith.truncf %146 : vector<16x32xf32> to vector<16x32xbf16>
      %c0_102 = arith.constant 0 : index
      %c0_103 = arith.constant 0 : index
      %148 = vector.load %arg12[%c0_102, %c0_103] : memref<32x64xbf16, #tpu.memory_space<vmem>>, vector<32x64xbf16>
      %cst_104 = arith.constant dense<0.000000e+00> : vector<16x64xf32>
      %149 = tpu.matmul %147, %148, %cst_104 {dimension_numbers = #tpu.dot_dimension_numbers<[1], [0], [0], [1], [0, 0, 1, 1], [], []>} : vector<16x32xbf16>, vector<32x64xbf16>, vector<16x64xf32> -> vector<16x64xf32>
      %c0_105 = arith.constant 0 : index
      %c0_106 = arith.constant 0 : index
      %150 = vector.load %arg13[%c0_105, %c0_106] : memref<1x64xf32, #tpu.memory_space<vmem>>, vector<1x64xf32>
      %151 = vector.broadcast %150 : vector<1x64xf32> to vector<16x64xf32>
      %152 = arith.addf %149, %151 : vector<16x64xf32>
      %cst_107 = arith.constant 5.000000e-01 : f32
      %153 = vector.broadcast %cst_107 : f32 to vector<16x64xf32>
      %154 = arith.mulf %153, %152 : vector<16x64xf32>
      %cst_108 = arith.constant 0.707106769 : f32
      %155 = vector.broadcast %cst_108 : f32 to vector<16x64xf32>
      %156 = arith.mulf %152, %155 : vector<16x64xf32>
      %157 = math.erf %156 : vector<16x64xf32>
      %cst_109 = arith.constant 1.000000e+00 : f32
      %158 = vector.broadcast %cst_109 : f32 to vector<16x64xf32>
      %159 = arith.addf %158, %157 : vector<16x64xf32>
      %160 = arith.mulf %154, %159 : vector<16x64xf32>
      %161 = arith.truncf %160 : vector<16x64xf32> to vector<16x64xbf16>
      %c0_110 = arith.constant 0 : index
      %c0_111 = arith.constant 0 : index
      %162 = vector.load %arg14[%c0_110, %c0_111] : memref<64x32xbf16, #tpu.memory_space<vmem>>, vector<64x32xbf16>
      %cst_112 = arith.constant dense<0.000000e+00> : vector<16x32xf32>
      %163 = tpu.matmul %161, %162, %cst_112 {dimension_numbers = #tpu.dot_dimension_numbers<[1], [0], [0], [1], [0, 0, 1, 1], [], []>} : vector<16x64xbf16>, vector<64x32xbf16>, vector<16x32xf32> -> vector<16x32xf32>
      %c0_113 = arith.constant 0 : index
      %c0_114 = arith.constant 0 : index
      %164 = vector.load %arg15[%c0_113, %c0_114] : memref<1x32xf32, #tpu.memory_space<vmem>>, vector<1x32xf32>
      %165 = vector.broadcast %164 : vector<1x32xf32> to vector<16x32xf32>
      %166 = arith.addf %163, %165 : vector<16x32xf32>
      %167 = arith.addf %166, %122 : vector<16x32xf32>
      %c0_115 = arith.constant 0 : index
      %c0_116 = arith.constant 0 : index
      %c0_117 = arith.constant 0 : index
      %168 = vector.load %arg16[%c0_115, %c0_116, %c0_117] : memref<1x16x32xf32, #tpu.memory_space<vmem>>, vector<1x16x32xf32>
      %169 = vector.shape_cast %168 : vector<1x16x32xf32> to vector<16x32xf32>
      %170 = vector.shape_cast %167 : vector<16x32xf32> to vector<1x16x32xf32>
      tpu.vector_store %arg16[%c0_115, %c0_116, %c0_117], %170 {strides = array<i32>} : memref<1x16x32xf32, #tpu.memory_space<vmem>>, vector<1x16x32xf32>,
    } else {
    }
    return
  }
  func.func @transform_0(%arg0: i32, %arg1: i32, %arg2: i32) -> (i32, i32, i32) {
    %c0_i32 = arith.constant 0 : i32
    %c0_i32_0 = arith.constant 0 : i32
    return %arg0, %arg1, %c0_i32 : i32, i32, i32
  }
  func.func @transform_1(%arg0: i32, %arg1: i32, %arg2: i32) -> (i32, i32, i32) {
    %c0_i32 = arith.constant 0 : i32
    %c0_i32_0 = arith.constant 0 : i32
    return %arg0, %arg2, %c0_i32 : i32, i32, i32
  }
  func.func @transform_2(%arg0: i32, %arg1: i32, %arg2: i32) -> (i32, i32, i32) {
    %c0_i32 = arith.constant 0 : i32
    return %arg0, %arg1, %arg2 : i32, i32, i32
  }
  func.func @transform_3(%arg0: i32, %arg1: i32, %arg2: i32) -> (i32, i32) {
    %c0_i32 = arith.constant 0 : i32
    %c0_i32_0 = arith.constant 0 : i32
    %c0_i32_1 = arith.constant 0 : i32
    return %c0_i32, %c0_i32_0 : i32, i32
  }
  func.func @transform_4(%arg0: i32, %arg1: i32, %arg2: i32) -> (i32, i32) {
    %c0_i32 = arith.constant 0 : i32
    %c0_i32_0 = arith.constant 0 : i32
    %c0_i32_1 = arith.constant 0 : i32
    return %c0_i32, %c0_i32_0 : i32, i32
  }
  func.func @transform_5(%arg0: i32, %arg1: i32, %arg2: i32) -> (i32, i32) {
    %c0_i32 = arith.constant 0 : i32
    %c0_i32_0 = arith.constant 0 : i32
    %c0_i32_1 = arith.constant 0 : i32
    return %c0_i32, %c0_i32_0 : i32, i32
  }
  func.func @transform_6(%arg0: i32, %arg1: i32, %arg2: i32) -> (i32, i32) {
    %c0_i32 = arith.constant 0 : i32
    %c0_i32_0 = arith.constant 0 : i32
    %c0_i32_1 = arith.constant 0 : i32
    return %c0_i32, %c0_i32_0 : i32, i32
  }
  func.func @transform_7(%arg0: i32, %arg1: i32, %arg2: i32) -> (i32, i32) {
    %c0_i32 = arith.constant 0 : i32
    %c0_i32_0 = arith.constant 0 : i32
    %c0_i32_1 = arith.constant 0 : i32
    return %c0_i32, %c0_i32_0 : i32, i32
  }
  func.func @transform_8(%arg0: i32, %arg1: i32, %arg2: i32) -> (i32, i32) {
    %c0_i32 = arith.constant 0 : i32
    %c0_i32_0 = arith.constant 0 : i32
    %c0_i32_1 = arith.constant 0 : i32
    return %c0_i32, %c0_i32_0 : i32, i32
  }
  func.func @transform_9(%arg0: i32, %arg1: i32, %arg2: i32) -> (i32, i32) {
    %c0_i32 = arith.constant 0 : i32
    %c0_i32_0 = arith.constant 0 : i32
    %c0_i32_1 = arith.constant 0 : i32
    return %c0_i32, %c0_i32_0 : i32, i32
  }
  func.func @transform_10(%arg0: i32, %arg1: i32, %arg2: i32) -> (i32, i32) {
    %c0_i32 = arith.constant 0 : i32
    %c0_i32_0 = arith.constant 0 : i32
    %c0_i32_1 = arith.constant 0 : i32
    return %c0_i32, %c0_i32_0 : i32, i32
  }
  func.func @transform_11(%arg0: i32, %arg1: i32, %arg2: i32) -> (i32, i32) {
    %c0_i32 = arith.constant 0 : i32
    %c0_i32_0 = arith.constant 0 : i32
    %c0_i32_1 = arith.constant 0 : i32
    return %c0_i32, %c0_i32_0 : i32, i32
  }
  func.func @transform_12(%arg0: i32, %arg1: i32, %arg2: i32) -> (i32, i32) {
    %c0_i32 = arith.constant 0 : i32
    %c0_i32_0 = arith.constant 0 : i32
    %c0_i32_1 = arith.constant 0 : i32
    return %c0_i32, %c0_i32_0 : i32, i32
  }
  func.func @transform_13(%arg0: i32, %arg1: i32, %arg2: i32) -> (i32, i32, i32) {
    %c0_i32 = arith.constant 0 : i32
    %c0_i32_0 = arith.constant 0 : i32
    return %arg0, %arg1, %c0_i32 : i32, i32, i32
  }
}

</mosaic_0001>

<bundles_post_ra>
// kernel: tpu_custom_call.1
= control target key start
LH: loop header
LB: loop body
LE: loop exit
PB: predicated region body
PF: predicated region fallthrough
CT: control target
= control target key end

     0   :  { %s4194_s0 = inlined_call_operand.hbm [shape: bf16[2,16,32], index: 0, kind: input, shape index: {}]   ;;  %s4195_s1 = inlined_call_operand.hbm [shape: bf16[2,16,32], index: 1, kind: input, shape index: {}]   ;;  %s4196_s2 = inlined_call_operand.hbm [shape: bf16[2,16,16], index: 2, kind: input, shape index: {}]   ;;  %s4197_s3 = inlined_call_operand.hbm [shape: bf16[32,96], index: 3, kind: input, shape index: {}]   ;;  %s4198_s4 = inlined_call_operand.hbm [shape: f32[1,96], index: 4, kind: input, shape index: {}]   ;;  %s4199_s5 = inlined_call_operand.hbm [shape: bf16[32,32], index: 5, kind: input, shape index: {}]   ;;  %s4200_s6 = inlined_call_operand.hbm [shape: f32[1,32], index: 6, kind: input, shape index: {}]   ;;  %s4201_s7 = inlined_call_operand.hbm [shape: f32[1,32], index: 7, kind: input, shape index: {}]   ;;  %s4202_s8 = inlined_call_operand.hbm [shape: f32[1,32], index: 8, kind: input, shape index: {}]   ;;  %s4203_s9 = inlined_call_operand.hbm [shape: bf16[32,64], index: 9, kind: input, shape index: {}]   ;;  %s4204_s10 = inlined_call_operand.hbm [shape: f32[1,64], index: 10, kind: input, shape index: {}]   ;;  %s4205_s11 = inlined_call_operand.hbm [shape: bf16[64,32], index: 11, kind: input, shape index: {}]   ;;  %s4206_s12 = inlined_call_operand.hbm [shape: f32[1,32], index: 12, kind: input, shape index: {}]   ;;  %s4207_s13 = inlined_call_operand.hbm [shape: f32[2,16,32], index: 13, kind: output, shape index: {}]  }
   0x1   :  { %4237 = sst [smem:[#allocation45_spill]] %s4194_s0 }
   0x2   :  { %4238 = sst [smem:[#allocation46_spill]] %s4195_s1 }
   0x3   :  { %4239 = sst [smem:[#allocation47_spill]] %s4196_s2 }
   0x4   :  { %4240 = sst [smem:[#allocation48_spill]] %s4197_s3 }
   0x5   :  { %4241 = sst [smem:[#allocation49_spill]] %s4198_s4 }
   0x6   :  { %4242 = sst [smem:[#allocation50_spill]] %s4199_s5 }
   0x7   :  { %4243 = sst [smem:[#allocation51_spill]] %s4201_s7 }
   0x8   :  { %4244 = sst [smem:[#allocation52_spill]] %s4203_s9 }
   0x9   :  { %4245 = sst [smem:[#allocation53_spill]] %s4204_s10 }
   0xa   :  { %4246 = sst [smem:[#allocation54_spill]] %s4205_s11 }
   0xb   :  { %4247 = sst [smem:[#allocation55_spill]] %s4206_s12 }
   0xc   :  { %4248 = sst [smem:[#allocation56_spill]] %s4207_s13 }
   0xd   :  { %18 = vsyncpa [#allocation9], 0 }
   0xe   :  { %20 = vsyncpa [#allocation9 + $0x1], 0 }
   0xf   :  { %21 = vsyncpa [#allocation12], 0 }
  0x10   :  { %23 = vsyncpa [#allocation12 + $0x1], 0 }
  0x11   :  { %24 = vsyncpa [#allocation15], 0 }
  0x12   :  { %25 = vsyncpa [#allocation18], 0 }
  0x13   :  { %26 = vsyncpa [#allocation21], 0 }
  0x14   :  { %27 = vsyncpa [#allocation24], 0 }
  0x15   :  { %28 = vsyncpa [#allocation27], 0 }
  0x16   :  { %29 = vsyncpa [#allocation10], 0 }
  0x17   :  { %31 = vsyncpa [#allocation10 + $0x1], 0  ;;  %s3327_s25 = smov 0   ;;  %s3329_s26 = smov 0  }
  0x18   :  { %s3331_s27 = smov 0   ;;  %s3333_s28 = smov 0  }
  0x19   :  { %s3335_s29 = smov 0   ;;  %s3337_s30 = smov 0  }
  0x1a LB: > { %4249 = sst [smem:[#allocation38_spill]] %s3216_s28  ;;  %s3358_s14 = sadd.s32 4294967295, %s3224_s30   ;;  %s3224_s30 = sphi %s3337_s30, %s37_s30   ;;  %s3220_s29 = sphi %s3335_s29, %s4307_s29   ;;  %s3216_s28 = sphi %s3333_s28, %s4306_s28   ;;  %s3212_s27 = sphi %s3331_s27, %s4310_s27   ;;  %s3208_s26 = sphi %s3329_s26, %s4309_s26   ;;  %s3204_s25 = sphi %s3327_s25, %s4308_s25  }
  0x1b   : > { %4250 = sst [smem:[#allocation39_spill]] %s3220_s29  ;;  %p2263_p0 = scmp.ge.s32.totalorder %s3224_s30, 1 }
  0x1c   : > { %4251 = sst [smem:[#allocation40_spill]] %s3224_s30  ;;  %p4214_p1 = scmp.eq.s32.totalorder %s3358_s14, 0 }
  0x1d   : > { %p385_p2 = scmp.lt.s32.totalorder %s3224_s30, 3  ;;  %s3226_s16 = smov [#allocation14]  }
  0x1e   : > { %s397_s17 = sshll.u32 %s3226_s16, 4  ;;  %s3227_s19 = smov [#allocation17]   ;;  %s3367_s17 = int_to_ptr.vmem [resolvable:$true] %s397_s17 }
  0x1f   : > { %p3363_p3 = pnand %p2263_p0, %p385_p2  ;;  %s421_s20 = sshll.u32 %s3227_s19, 4  ;;  %s3378_s20 = int_to_ptr.vmem [resolvable:$true] %s421_s20 }
  0x20   : > { %s3228_s21 = smov [#allocation20]   ;;  %s4255_s3 = sld [smem:[#allocation48_spill]] }
  0x21   : > { %s4252_s15 = scalar_select %p3363_p3, 1, 0 }
  0x22   : > { %p2519_p4 = pneg %p3363_p3  ;;  %s3380_s22 = sshll.u32 %s3228_s21, 4  ;;  %s447_s22 = int_to_ptr.vmem [resolvable:$true] %s3380_s22 }
  0x23   : > { %4253 = sst [smem:[#allocation41_spill]] %s4252_s15 }
  0x24   : > { %p3374_p6 = pnand %p2519_p4, %p4214_p1 }
  0x26   : > { %s4254_s18 = scalar_select %p3374_p6, 1, 0 }
  0x27   : > { %s2748_s16 = scalar_lea.hbm %s4255_s3, 256  ;;  %p3390_p8 = pneg %p3374_p6 }
  0x28   : > { %p2749_p7 = scmp.ne.s32.totalorder %s4255_s3, %s2748_s16  ;;  %p2755_p11 = scmp.lt.u32.totalorder %s2748_s16, %s4255_s3 }
  0x29   : > { %s4256_s15 = scalar_select %p3390_p8, 1, 0 }
  0x2a   : > { %p2751_p9 = pnand %p3390_p8, %p2749_p7 }
  0x2c   : > { %p2752_p10 = pneg %p2751_p9 }
  0x2e   : > { %p2757_p12 = pnand %p2755_p11, %p2752_p10 }
  0x30   : > { %2760 = shalt.err (!%p2757_p12)
}
  0x31   : > { %s2761_s13 = scalar_lea.vmem %s3367_s17, 256  ;;  %p2769_p4 = scmp.lt.s32.totalorder %s3367_s17, %s3367_s17 }
  0x32   : > { %p2762_p13 = scmp.ne.s32.totalorder %s3367_s17, %s2761_s13  ;;  %p2770_p5 = scmp.lt.s32.totalorder %s2761_s13, %s2761_s13 }
  0x34   : > { %p2764_p0 = pnand %p2762_p13, %p3390_p8  ;;  %p2771_p7 = por %p2770_p5, %p2769_p4 }
  0x36   : > { %p2765_p2 = pneg %p2764_p0 }
  0x38   : > { %p2772_p9 = pnand %p2771_p7, %p2765_p2 }
  0x3a   : > { %2775 = shalt.err (!%p2772_p9)
}
  0x3b   : > { %s4216_s28 = smov 64   ;;  %s4218_s23 = smov 4  }
  0x3c   : > { %2522 = dma.hbm_to_vmem [thread:$0]  (!%p3374_p6), %s4255_s3, 256, %s3367_s17, [#allocation15], %s4216_s28, %s4216_s28, %s4218_s23  }
  0x3d   : > { %s4257_s5 = sld [smem:[#allocation50_spill]] }
  0x43   : > { %s2776_s13 = scalar_lea.hbm %s4257_s5, 256 }
  0x44   : > { %p2777_p5 = scmp.ne.s32.totalorder %s4257_s5, %s2776_s13  ;;  %p2783_p12 = scmp.lt.u32.totalorder %s2776_s13, %s4257_s5 }
  0x46   : > { %p2779_p10 = pnand %p2777_p5, %p3390_p8 }
  0x48   : > { %p2780_p11 = pneg %p2779_p10 }
  0x4a   : > { %p2785_p13 = pnand %p2783_p12, %p2780_p11 }
  0x4c   : > { %2788 = shalt.err (!%p2785_p13)
}
  0x4d   : > { %s2789_s17 = scalar_lea.vmem %s3378_s20, 256  ;;  %p2797_p7 = scmp.lt.s32.totalorder %s3378_s20, %s3378_s20 }
  0x4e   : > { %p2790_p0 = scmp.ne.s32.totalorder %s3378_s20, %s2789_s17  ;;  %p2798_p9 = scmp.lt.s32.totalorder %s2789_s17, %s2789_s17 }
  0x50   : > { %p2792_p2 = pnand %p2790_p0, %p3390_p8  ;;  %p2799_p5 = por %p2798_p9, %p2797_p7 }
  0x52   : > { %p2793_p4 = pneg %p2792_p2 }
  0x54   : > { %p2800_p10 = pnand %p2799_p5, %p2793_p4 }
  0x56   : > { %2803 = shalt.err (!%p2800_p10)
}
  0x57   : > { %2528 = dma.hbm_to_vmem [thread:$0]  (!%p3374_p6), %s4257_s5, 256, %s3378_s20, [#allocation18], %s4216_s28, %s4216_s28, %s4218_s23  }
  0x58   : > { %s4258_s7 = sld [smem:[#allocation51_spill]] }
  0x5e   : > { %s2804_s24 = scalar_lea.hbm %s4258_s7, 16 }
  0x5f   : > { %p2805_p11 = scmp.ne.s32.totalorder %s4258_s7, %s2804_s24  ;;  %p2811_p0 = scmp.lt.u32.totalorder %s2804_s24, %s4258_s7 }
  0x61   : > { %p2807_p12 = pnand %p2805_p11, %p3390_p8 }
  0x63   : > { %p2808_p13 = pneg %p2807_p12 }
  0x65   : > { %p2813_p2 = pnand %p2811_p0, %p2808_p13 }
  0x67   : > { %2816 = shalt.err (!%p2813_p2)
}
  0x68   : > { %s2817_s17 = scalar_lea.vmem %s447_s22, 16  ;;  %s2824_s20 = scalar_lea.vmem %s447_s22, 32 }
  0x69   : > { %p2818_p4 = scmp.ne.s32.totalorder %s447_s22, %s2817_s17  ;;  %p2825_p5 = scmp.lt.s32.totalorder %s447_s22, %s447_s22 }
  0x6a   : > { %p2826_p10 = scmp.lt.s32.totalorder %s2824_s20, %s2817_s17 }
  0x6b   : > { %p2820_p7 = pnand %p2818_p4, %p3390_p8 }
  0x6c   : > { %p2827_p1 = por %p2826_p10, %p2825_p5 }
  0x6d   : > { %p2821_p9 = pneg %p2820_p7 }
  0x6f   : > { %p2828_p3 = pnand %p2827_p1, %p2821_p9 }
  0x71   : > { %2831 = shalt.err (!%p2828_p3)
}
  0x72   : > { %2534 = dma.hbm_to_vmem [thread:$0]  (!%p3374_p6), %s4258_s7, 16, %s447_s22, [#allocation21]  }
  0x73   : > { %s3231_s10 = smov [#allocation23]   ;;  %s3232_s24 = smov [#allocation26]  }
  0x74   : > { %s467_s12 = sshll.u32 %s3231_s10, 4  ;;  %s491_s16 = sshll.u32 %s3232_s24, 4  ;;  %s468_s12 = int_to_ptr.vmem [resolvable:$true] %s467_s12  ;;  %s492_s16 = int_to_ptr.vmem [resolvable:$true] %s491_s16 }
  0x75   : > { %s4259_s9 = sld [smem:[#allocation52_spill]] }
  0x7b   : > { %s2832_s13 = scalar_lea.hbm %s4259_s9, 256 }
  0x7c   : > { %p2833_p1 = scmp.ne.s32.totalorder %s4259_s9, %s2832_s13  ;;  %p2839_p12 = scmp.lt.u32.totalorder %s2832_s13, %s4259_s9 }
  0x7e   : > { %p2835_p3 = pnand %p2833_p1, %p3390_p8 }
  0x80   : > { %p2836_p11 = pneg %p2835_p3 }
  0x82   : > { %p2841_p13 = pnand %p2839_p12, %p2836_p11 }
  0x84   : > { %2844 = shalt.err (!%p2841_p13)
}
  0x85   : > { %s2845_s22 = scalar_lea.vmem %s468_s12, 256  ;;  %p2853_p7 = scmp.lt.s32.totalorder %s468_s12, %s468_s12 }
  0x86   : > { %p2846_p0 = scmp.ne.s32.totalorder %s468_s12, %s2845_s22  ;;  %p2854_p9 = scmp.lt.s32.totalorder %s2845_s22, %s2845_s22 }
  0x88   : > { %p2848_p2 = pnand %p2846_p0, %p3390_p8  ;;  %p2855_p5 = por %p2854_p9, %p2853_p7 }
  0x8a   : > { %p2849_p4 = pneg %p2848_p2 }
  0x8c   : > { %p2856_p10 = pnand %p2855_p5, %p2849_p4 }
  0x8e   : > { %2859 = shalt.err (!%p2856_p10)
}
  0x8f   : > { %s4260_s2 = smov 64   ;;  %s4261_s11 = sld [smem:[#allocation54_spill]] }
  0x90   : > { %2540 = dma.hbm_to_vmem [thread:$0]  (!%p3374_p6), %s4259_s9, 256, %s468_s12, [#allocation24], %s4260_s2, %s4260_s2, %s4218_s23  }
  0x95   : > { %s2860_s21 = scalar_lea.hbm %s4261_s11, 512 }
  0x96   : > { %p2861_p1 = scmp.ne.s32.totalorder %s4261_s11, %s2860_s21  ;;  %p2867_p12 = scmp.lt.u32.totalorder %s2860_s21, %s4261_s11 }
  0x98   : > { %p2863_p3 = pnand %p2861_p1, %p3390_p8 }
  0x9a   : > { %p2864_p11 = pneg %p2863_p3 }
  0x9c   : > { %p2869_p13 = pnand %p2867_p12, %p2864_p11 }
  0x9e   : > { %2872 = shalt.err (!%p2869_p13)
}
  0x9f   : > { %s2873_s22 = scalar_lea.vmem %s492_s16, 512  ;;  %p2881_p7 = scmp.lt.s32.totalorder %s492_s16, %s492_s16 }
  0xa0   : > { %p2874_p0 = scmp.ne.s32.totalorder %s492_s16, %s2873_s22  ;;  %p2882_p9 = scmp.lt.s32.totalorder %s2873_s22, %s2873_s22 }
  0xa2   : > { %p2876_p2 = pnand %p2874_p0, %p3390_p8  ;;  %p2883_p5 = por %p2882_p9, %p2881_p7 }
  0xa4   : > { %p2877_p4 = pneg %p2876_p2 }
  0xa6   : > { %p2884_p10 = pnand %p2883_p5, %p2877_p4 }
  0xa8   : > { %2887 = shalt.err (!%p2884_p10)
}
  0xa9   : > { %2546 = dma.hbm_to_vmem [thread:$0]  (!%p3374_p6), %s4261_s11, 512, %s492_s16, [#allocation27], %s4260_s2, %s4260_s2, %s4218_s23  }
  0xaa   : > { %s2262_s10 = sadd.s32 4294967294, %s3224_s30   ;;  %s56_s24 = sadd.s32 1, %s3220_s29 }
  0xab   : > { %s65_s19 = sadd.s32 1, %s3212_s27  ;;  %p58_p1 = scmp.ge.s32.totalorder %s56_s24, 2 }
  0xac   : > { %p72_p3 = scmp.ne.s32.totalorder %s3212_s27, %s3208_s26  ;;  %p73_p11 = scmp.eq.s32.totalorder %s3224_s30, 0 }
  0xad   : > { %p78_p12 = scmp.ne.s32.totalorder %s3208_s26, %s3204_s25  ;;  %s4312_s24 = smov (%p58_p1, %s56_s24), 0 }
  0xae   : > { %4262 = sst [smem:[#allocation42_spill]] %s4312_s24  ;;  %p3511_p13 = por %p73_p11, %p72_p3 }
  0xaf   : > { %p4264_p0 = scmp.eq.s32.totalorder %s3358_s14, 0  ;;  %s60_s13 = ssub.s32 %s3220_s29, %s4312_s24 }
  0xb0   : > { %p372_p4 = scmp.eq.s32.totalorder %s3358_s14, 1  ;;  %p63_p7 = scmp.eq.s32.totalorder %s60_s13, 0 }
  0xb1   : > { %p3517_p2 = por %p4264_p0, %p78_p12  ;;  %p378_p9 = scmp.eq.s32.totalorder %s2262_s10, 1 }
  0xb2   : > { %p3524_p5 = por %p372_p4, %p72_p3  ;;  %p2574_p10 = scmp.lt.s32.totalorder %s3224_s30, 2 }
  0xb3   : > { %s4265_s16 = scalar_select %p3517_p2, 1, 0 }
  0xb4   : > { %s4266_s17 = scalar_select %p3524_p5, 1, 0 }
  0xb5   : > { %s3530_s20 = scalar_select %p63_p7, %s3212_s27, %s65_s19  }
  0xb6   : > { %p3532_p1 = por %p378_p9, %p78_p12  ;;  %s4220_s22 = sand.u32 1, %s3212_s27  }
  0xb7   : > { %4267 = sst [smem:[#allocation43_spill]] %s3530_s20  ;;  %s3539_s12 = sshll.u32 %s4220_s22, 3 }
  0xb8   : > { %s4268_s0 = scalar_select %p3532_p1, 1, 0 }
  0xb9   : > { %s3542_s28 = sshll.u32 %s3220_s29, 7  ;;  %p3546_p3 = pnand %p2574_p10, %p3511_p13 }
  0xba   : > { %4269 = sst [smem:[#allocation44_spill]] %s4268_s0  ;;  %s539_s19 = sand.u32 1, %s3224_s30  }
  0xbb   : > { %s4270_s10 = scalar_select %p3546_p3, 1, 0 }
  0xbc   : > { %s4271_s1 = sld [smem:[#allocation46_spill]]  ;;  %s543_s22 = scalar_lea.vmem [#allocation11], %s3539_s12 }
  0xbd   : > { %s552_s5 = sshll.u32 %s543_s22, 4  ;;  %s3233_s21 = smov [#allocation16]   ;;  %s3558_s5 = int_to_ptr.vmem [resolvable:$true] %s552_s5 }
  0xbe   : > { %s3560_s7 = sshll.u32 %s3233_s21, 4  ;;  %s3562_s9 = scalar_lea.sflag [#allocation12], %s539_s19  ;;  %s412_s7 = int_to_ptr.vmem [resolvable:$true] %s3560_s7 }
  0xbf   : > { %p3568_p12 = pneg %p3546_p3 }
  0xc1   : > { %s4272_s23 = scalar_select %p3568_p12, 1, 0 }
  0xc2   : > { %s3555_s3 = scalar_lea.hbm %s4271_s1, %s3542_s28  ;;  %s2893_s24 = scalar_lea.hbm %s4271_s1, 256 }
  0xc3   : > { %s2888_s11 = scalar_lea.hbm %s3555_s3, 128  ;;  %p2894_p4 = scmp.lt.u32.totalorder %s3555_s3, %s4271_s1 }
  0xc4   : > { %p2889_p11 = scmp.ne.s32.totalorder %s3555_s3, %s2888_s11  ;;  %p2895_p7 = scmp.lt.u32.totalorder %s2893_s24, %s2888_s11 }
  0xc5   : > { %p2897_p10 = scmp.lt.u32.totalorder %s2888_s11, %s3555_s3 }
  0xc6   : > { %p2891_p13 = pnand %p3568_p12, %p2889_p11  ;;  %p2896_p9 = por %p2895_p7, %p2894_p4 }
  0xc8   : > { %p2892_p0 = pneg %p2891_p13  ;;  %p2898_p1 = por %p2897_p10, %p2896_p9 }
  0xca   : > { %p2899_p5 = pnand %p2898_p1, %p2892_p0 }
  0xcc   : > { %2902 = shalt.err (!%p2899_p5)
}
  0xcd   : > { %s2903_s19 = scalar_lea.vmem %s3558_s5, 128  ;;  %s3234_s13 = smov [#allocation11]  }
  0xce   : > { %p2904_p11 = scmp.ne.s32.totalorder %s3558_s5, %s2903_s19  ;;  %s2908_s22 = sshll.u32 %s3234_s13, 4  ;;  %s2909_s22 = int_to_ptr.vmem [resolvable:$false] %s2908_s22 }
  0xcf   : > { %s2910_s29 = scalar_lea.vmem %s2909_s22, 256  ;;  %p2911_p6 = scmp.lt.s32.totalorder %s3558_s5, %s2909_s22 }
  0xd0   : > { %p2906_p13 = pnand %p2904_p11, %p3568_p12  ;;  %p2912_p8 = scmp.lt.s32.totalorder %s2910_s29, %s2903_s19 }
  0xd2   : > { %p2907_p2 = pneg %p2906_p13  ;;  %p2913_p4 = por %p2912_p8, %p2911_p6 }
  0xd4   : > { %p2914_p7 = pnand %p2913_p4, %p2907_p2 }
  0xd6   : > { %2917 = shalt.err (!%p2914_p7)
}
  0xd7   : > { %s4273_s11 = smov 4   ;;  %s4274_s4 = sld [smem:[#allocation49_spill]] }
  0xd8   : > { %2556 = dma.hbm_to_vmem [thread:$0]  (!%p3546_p3), %s3555_s3, 128, %s3558_s5, %s3562_s9, %s4260_s2, %s4260_s2, %s4273_s11  }
  0xd9   : > { %p4275_p8 = scmp.ne.s32.totalorder %s4256_s15, 0 }
  0xdd   : > { %s2918_s13 = scalar_lea.hbm %s4274_s4, 16 }
  0xde   : > { %p2919_p6 = scmp.ne.s32.totalorder %s4274_s4, %s2918_s13  ;;  %p2925_p1 = scmp.lt.u32.totalorder %s2918_s13, %s4274_s4 }
  0xe0   : > { %p2921_p2 = pnand %p2919_p6, %p4275_p8 }
  0xe2   : > { %p2922_p5 = pneg %p2921_p2 }
  0xe4   : > { %p2927_p0 = pnand %p2925_p1, %p2922_p5 }
  0xe6   : > { %2930 = shalt.err (!%p2927_p0)
}
  0xe7   : > { %s2931_s20 = scalar_lea.vmem %s412_s7, 16  ;;  %s2938_s3 = scalar_lea.vmem %s412_s7, 32 }
  0xe8   : > { %p2932_p9 = scmp.ne.s32.totalorder %s412_s7, %s2931_s20  ;;  %p2939_p13 = scmp.lt.s32.totalorder %s412_s7, %s412_s7 }
  0xe9   : > { %p2940_p4 = scmp.lt.s32.totalorder %s2938_s3, %s2931_s20 }
  0xea   : > { %p2934_p10 = pnand %p2932_p9, %p4275_p8 }
  0xeb   : > { %p2941_p7 = por %p2940_p4, %p2939_p13 }
  0xec   : > { %p2935_p11 = pneg %p2934_p10 }
  0xee   : > { %p2942_p3 = pnand %p2941_p7, %p2935_p11 }
  0xf0   : > { %2945 = shalt.err (!%p2942_p3)
}
  0xf1   : > { %p4276_p6 = scmp.ne.s32.totalorder %s4254_s18, 0  ;;  %s3235_s1 = smov [#allocation19]  }
  0xf2   : > { %s435_s21 = sshll.u32 %s3235_s1, 4  ;;  %s3236_s13 = smov [#allocation22]   ;;  %s436_s21 = int_to_ptr.vmem [resolvable:$true] %s435_s21 }
  0xf3   : > { %2525 = dma.hbm_to_vmem [thread:$0]  (!%p4276_p6), %s4274_s4, 16, %s412_s7, [#allocation15]  }
  0xf4   : > { %s457_s19 = sshll.u32 %s3236_s13, 4  ;;  %s2946_s30 = scalar_lea.hbm %s4200_s6, 16  ;;  %s458_s19 = int_to_ptr.vmem [resolvable:$true] %s457_s19 }
  0xf5   : > { %p2947_p3 = scmp.ne.s32.totalorder %s4200_s6, %s2946_s30  ;;  %p2953_p1 = scmp.lt.u32.totalorder %s2946_s30, %s4200_s6 }
  0xf7   : > { %p2949_p2 = pnand %p2947_p3, %p4275_p8 }
  0xf9   : > { %p2950_p5 = pneg %p2949_p2 }
  0xfb   : > { %p2955_p0 = pnand %p2953_p1, %p2950_p5 }
  0xfd   : > { %2958 = shalt.err (!%p2955_p0)
}
  0xfe   : > { %s2959_s7 = scalar_lea.vmem %s436_s21, 16  ;;  %s2966_s24 = scalar_lea.vmem %s436_s21, 32 }
  0xff   : > { %p2960_p9 = scmp.ne.s32.totalorder %s436_s21, %s2959_s7  ;;  %p2967_p13 = scmp.lt.s32.totalorder %s436_s21, %s436_s21 }
 0x100   : > { %p2968_p4 = scmp.lt.s32.totalorder %s2966_s24, %s2959_s7 }
 0x101   : > { %p2962_p10 = pnand %p2960_p9, %p4275_p8 }
 0x102   : > { %p2969_p7 = por %p2968_p4, %p2967_p13 }
 0x103   : > { %p2963_p11 = pneg %p2962_p10 }
 0x105   : > { %p2970_p12 = pnand %p2969_p7, %p2963_p11 }
 0x107   : > { %2973 = shalt.err (!%p2970_p12)
}
 0x108   : > { %2531 = dma.hbm_to_vmem [thread:$0]  (!%p4276_p6), %s4200_s6, 16, %s436_s21, [#allocation18]  }
 0x109   : > { %s2974_s22 = scalar_lea.hbm %s4202_s8, 16 }
 0x10a   : > { %p2975_p3 = scmp.ne.s32.totalorder %s4202_s8, %s2974_s22  ;;  %p2981_p12 = scmp.lt.u32.totalorder %s2974_s22, %s4202_s8 }
 0x10c   : > { %p2977_p2 = pnand %p2975_p3, %p4275_p8 }
 0x10e   : > { %p2978_p5 = pneg %p2977_p2 }
 0x110   : > { %p2983_p1 = pnand %p2981_p12, %p2978_p5 }
 0x112   : > { %2986 = shalt.err (!%p2983_p1)
}
 0x113   : > { %s2987_s7 = scalar_lea.vmem %s458_s19, 16  ;;  %s2994_s21 = scalar_lea.vmem %s458_s19, 32 }
 0x114   : > { %p2988_p0 = scmp.ne.s32.totalorder %s458_s19, %s2987_s7  ;;  %p2995_p11 = scmp.lt.s32.totalorder %s458_s19, %s458_s19 }
 0x115   : > { %p2996_p13 = scmp.lt.s32.totalorder %s2994_s21, %s2987_s7 }
 0x116   : > { %p2990_p9 = pnand %p2988_p0, %p4275_p8 }
 0x117   : > { %p2997_p4 = por %p2996_p13, %p2995_p11 }
 0x118   : > { %p2991_p10 = pneg %p2990_p9 }
 0x11a   : > { %p2998_p7 = pnand %p2997_p4, %p2991_p10 }
 0x11c   : > { %3001 = shalt.err (!%p2998_p7)
}
 0x11d   : > { %2537 = dma.hbm_to_vmem [thread:$0]  (!%p4276_p6), %s4202_s8, 16, %s458_s19, [#allocation21]  }
 0x11e   : > { %s3237_s13 = smov [#allocation25]   ;;  %s3238_s0 = smov [#allocation28]  }
 0x11f   : > { %s481_s30 = sshll.u32 %s3237_s13, 4  ;;  %s505_s22 = sshll.u32 %s3238_s0, 4  ;;  %s482_s30 = int_to_ptr.vmem [resolvable:$true] %s481_s30  ;;  %s506_s22 = int_to_ptr.vmem [resolvable:$true] %s505_s22 }
 0x120   : > { %s4277_s3 = sld [smem:[#allocation53_spill]] }
 0x126   : > { %s3002_s5 = scalar_lea.hbm %s4277_s3, 16 }
 0x127   : > { %p3003_p3 = scmp.ne.s32.totalorder %s4277_s3, %s3002_s5  ;;  %p3009_p12 = scmp.lt.u32.totalorder %s3002_s5, %s4277_s3 }
 0x129   : > { %p3005_p2 = pnand %p3003_p3, %p4275_p8 }
 0x12b   : > { %p3006_p5 = pneg %p3005_p2 }
 0x12d   : > { %p3011_p1 = pnand %p3009_p12, %p3006_p5 }
 0x12f   : > { %3014 = shalt.err (!%p3011_p1)
}
 0x130   : > { %s3015_s19 = scalar_lea.vmem %s482_s30, 16  ;;  %s3022_s1 = scalar_lea.vmem %s482_s30, 32 }
 0x131   : > { %p3016_p0 = scmp.ne.s32.totalorder %s482_s30, %s3015_s19  ;;  %p3023_p11 = scmp.lt.s32.totalorder %s482_s30, %s482_s30 }
 0x132   : > { %p3024_p13 = scmp.lt.s32.totalorder %s3022_s1, %s3015_s19 }
 0x133   : > { %p3018_p9 = pnand %p3016_p0, %p4275_p8 }
 0x134   : > { %p3025_p4 = por %p3024_p13, %p3023_p11 }
 0x135   : > { %p3019_p10 = pneg %p3018_p9 }
 0x137   : > { %p3026_p7 = pnand %p3025_p4, %p3019_p10 }
 0x139   : > { %3029 = shalt.err (!%p3026_p7)
}
 0x13a   : > { %2543 = dma.hbm_to_vmem [thread:$0]  (!%p4276_p6), %s4277_s3, 16, %s482_s30, [#allocation24]  }
 0x13b   : > { %s4278_s20 = sld [smem:[#allocation55_spill]] }
 0x141   : > { %s3030_s5 = scalar_lea.hbm %s4278_s20, 16 }
 0x142   : > { %p3031_p3 = scmp.ne.s32.totalorder %s4278_s20, %s3030_s5  ;;  %p3037_p12 = scmp.lt.u32.totalorder %s3030_s5, %s4278_s20 }
 0x144   : > { %p3033_p2 = pnand %p3031_p3, %p4275_p8 }
 0x146   : > { %p3034_p5 = pneg %p3033_p2 }
 0x148   : > { %p3039_p1 = pnand %p3037_p12, %p3034_p5 }
 0x14a   : > { %3042 = shalt.err (!%p3039_p1)
}
 0x14b   : > { %s3043_s1 = scalar_lea.vmem %s506_s22, 16  ;;  %s3050_s30 = scalar_lea.vmem %s506_s22, 32 }
 0x14c   : > { %p3044_p0 = scmp.ne.s32.totalorder %s506_s22, %s3043_s1  ;;  %p3051_p11 = scmp.lt.s32.totalorder %s506_s22, %s506_s22 }
 0x14d   : > { %p3052_p13 = scmp.lt.s32.totalorder %s3050_s30, %s3043_s1 }
 0x14e   : > { %p3046_p9 = pnand %p3044_p0, %p4275_p8 }
 0x14f   : > { %p3053_p4 = por %p3052_p13, %p3051_p11 }
 0x150   : > { %p3047_p10 = pneg %p3046_p9 }
 0x152   : > { %p3054_p7 = pnand %p3053_p4, %p3047_p10 }
 0x154   : > { %3057 = shalt.err (!%p3054_p7)
}
 0x155   : > { %2549 = dma.hbm_to_vmem [thread:$0]  (!%p4276_p6), %s4278_s20, 16, %s506_s22, [#allocation27]  }
 0x156   : > { %s4279_s29 = sld [smem:[#allocation45_spill]]  ;;  %s520_s21 = scalar_lea.vmem [#allocation8], %s3539_s12 }
 0x157   : > { %s529_s18 = sshll.u32 %s520_s21, 4  ;;  %s4281_s1 = sld [smem:[#allocation47_spill]]  ;;  %s3693_s18 = int_to_ptr.vmem [resolvable:$true] %s529_s18 }
 0x158   : > { %s4282_s13 = sand.u32 1, %s3212_s27   ;;  %p4283_p6 = scmp.ne.s32.totalorder %s4272_s23, 0 }
 0x159   : > { %s3703_s22 = scalar_lea.sflag [#allocation9], %s4282_s13 }
 0x15c   : > { %s4280_s5 = smov %s4279_s29  ;;  %s3690_s7 = scalar_lea.hbm %s4279_s29, %s3542_s28 }
 0x15d   : > { %s3699_s30 = scalar_lea.hbm %s4281_s1, %s3542_s28  ;;  %s3058_s0 = scalar_lea.hbm %s3690_s7, 128 }
 0x15e   : > { %p3059_p8 = scmp.ne.s32.totalorder %s3690_s7, %s3058_s0  ;;  %s3063_s29 = scalar_lea.hbm %s4280_s5, 256 }
 0x15f   : > { %p3064_p5 = scmp.lt.u32.totalorder %s3690_s7, %s4280_s5  ;;  %p3065_p12 = scmp.lt.u32.totalorder %s3063_s29, %s3058_s0 }
 0x160   : > { %p3061_p3 = pnand %p3059_p8, %p4283_p6  ;;  %p3067_p0 = scmp.lt.u32.totalorder %s3058_s0, %s3690_s7 }
 0x161   : > { %p3066_p1 = por %p3065_p12, %p3064_p5 }
 0x162   : > { %p3062_p2 = pneg %p3061_p3 }
 0x163   : > { %p3068_p9 = por %p3067_p0, %p3066_p1 }
 0x165   : > { %p3069_p10 = pnand %p3068_p9, %p3062_p2 }
 0x167   : > { %3072 = shalt.err (!%p3069_p10)
}
 0x168   : > { %s3073_s28 = scalar_lea.vmem %s3693_s18, 128  ;;  %s3239_s24 = smov [#allocation8]  }
 0x169   : > { %p3074_p11 = scmp.ne.s32.totalorder %s3693_s18, %s3073_s28  ;;  %s3078_s19 = sshll.u32 %s3239_s24, 4  ;;  %s3079_s19 = int_to_ptr.vmem [resolvable:$false] %s3078_s19 }
 0x16a   : > { %s3080_s3 = scalar_lea.vmem %s3079_s19, 256  ;;  %p3081_p7 = scmp.lt.s32.totalorder %s3693_s18, %s3079_s19 }
 0x16b   : > { %p3076_p13 = pnand %p3074_p11, %p4283_p6  ;;  %p3082_p8 = scmp.lt.s32.totalorder %s3080_s3, %s3073_s28 }
 0x16d   : > { %p3077_p4 = pneg %p3076_p13  ;;  %p3083_p3 = por %p3082_p8, %p3081_p7 }
 0x16f   : > { %p3084_p5 = pnand %p3083_p3, %p3077_p4 }
 0x171   : > { %3087 = shalt.err (!%p3084_p5)
}
 0x172   : > { %p4284_p2 = scmp.ne.s32.totalorder %s4270_s10, 0  ;;  %s566_s13 = scalar_lea.vmem [#allocation13], %s3539_s12 }
 0x173   : > { %s576_s0 = sshll.u32 %s566_s13, 4  ;;  %s3088_s15 = scalar_lea.hbm %s3699_s30, 128  ;;  %s3731_s0 = int_to_ptr.vmem [resolvable:$true] %s576_s0 }
 0x174   : > { %2553 = dma.hbm_to_vmem [thread:$0]  (!%p4284_p2), %s3690_s7, 128, %s3693_s18, %s3703_s22, %s4260_s2, %s4260_s2, %s4273_s11  }
 0x175   : > { %p3089_p12 = scmp.ne.s32.totalorder %s3699_s30, %s3088_s15  ;;  %s3093_s21 = scalar_lea.hbm %s4281_s1, 256 }
 0x176   : > { %p3094_p9 = scmp.lt.u32.totalorder %s3699_s30, %s4281_s1  ;;  %p3095_p10 = scmp.lt.u32.totalorder %s3093_s21, %s3088_s15 }
 0x177   : > { %p3091_p1 = pnand %p3089_p12, %p4283_p6  ;;  %p3097_p13 = scmp.lt.u32.totalorder %s3088_s15, %s3699_s30 }
 0x178   : > { %p3096_p11 = por %p3095_p10, %p3094_p9 }
 0x179   : > { %p3092_p0 = pneg %p3091_p1 }
 0x17a   : > { %p3098_p4 = por %p3097_p13, %p3096_p11 }
 0x17c   : > { %p3099_p7 = pnand %p3098_p4, %p3092_p0 }
 0x17e   : > { %3102 = shalt.err (!%p3099_p7)
}
 0x17f   : > { %s3103_s12 = scalar_lea.vmem %s3731_s0, 128  ;;  %s3240_s7 = smov [#allocation13]  }
 0x180   : > { %p3104_p8 = scmp.ne.s32.totalorder %s3731_s0, %s3103_s12  ;;  %s3108_s18 = sshll.u32 %s3240_s7, 4  ;;  %s3109_s18 = int_to_ptr.vmem [resolvable:$false] %s3108_s18 }
 0x181   : > { %s3110_s22 = scalar_lea.vmem %s3109_s18, 256  ;;  %p3111_p12 = scmp.lt.s32.totalorder %s3731_s0, %s3109_s18 }
 0x182   : > { %p3106_p3 = pnand %p3104_p8, %p4283_p6  ;;  %p3112_p1 = scmp.lt.s32.totalorder %s3110_s22, %s3103_s12 }
 0x184   : > { %p3107_p5 = pneg %p3106_p3  ;;  %p3113_p9 = por %p3112_p1, %p3111_p12 }
 0x186   : > { %p3114_p10 = pnand %p3113_p9, %p3107_p5 }
 0x188   : > { %3117 = shalt.err (!%p3114_p10)
}
 0x189   : > { %2559 = dma.hbm_to_vmem [thread:$0]  (!%p4284_p2), %s3699_s30, 128, %s3731_s0, %s3562_s9, %s4260_s2, %s4260_s2, %s4273_s11  }
 0x18a   : > { %s4285_s23 = sld [smem:[#allocation41_spill]] }
 0x190   : > { %p4286_p6 = scmp.ne.s32.totalorder %s4285_s23, 0 }
 0x191   : > { %s3761_s19 = sand.u32 (!%p4286_p6), 1, %s3208_s26   ;;  %p4287_p0 = scmp.ne.s32.totalorder (!%p4286_p6), %s4265_s16, 0 }
 0x192   : > { %588 = sbr.rel (%p4286_p6) target bundleno = 2843 (0xb1b), region = 72  ;;  %s3764_s3 = sshll.u32 (!%p4286_p6), %s3761_s19, 3 }
 0x193   : > { %s591_s10 = scalar_lea.sflag (!%p4286_p6), [#allocation9], %s3761_s19  ;;  %s594_s13 = scalar_lea.vmem (!%p4286_p6), [#allocation8], %s3764_s3 }
 0x199   : > { %3171 = dma.done.wait (%p4287_p0), %s591_s10, 128  }
 0x19a   : > { %3173 = vsyncadd (%p4287_p0), %s591_s10, 4294967168  ;;  %s599_s9 = sand.u32 1, %s3358_s14   ;;  %s603_s11 = scalar_lea.vmem [#allocation11], %s3764_s3 }
 0x19b   : > { %s600_s2 = scalar_lea.sflag [#allocation12], %s599_s9 }
 0x19c   : > { %3175 = dma.done.wait (%p4287_p0), %s600_s2, 256  }
 0x19d   : > { %3177 = vsyncadd (%p4287_p0), %s600_s2, 4294967040  ;;  %s612_s30 = scalar_lea.vmem [#allocation13], %s3764_s3  ;;  %p4288_p2 = scmp.eq.s32.totalorder %s3358_s14, 0 }
 0x19f   : > { %3179 = dma.done.wait (%p4288_p2), [#allocation15], 272   ;;  %p4289_p11 = pmov %p4288_p2 }
 0x1a0   : > { %p4290_p13 = pmov %p4288_p2 }
 0x1a1   : > { %3181 = vsyncadd (%p4289_p11), [#allocation15], 4294967024 }
 0x1a2   : > { %3183 = dma.done.wait (%p4290_p13), [#allocation18], 272   ;;  %p4291_p4 = pmov %p4288_p2 }
 0x1a3   : > { %p4292_p7 = pmov %p4288_p2 }
 0x1a4   : > { %3185 = vsyncadd (%p4291_p4), [#allocation18], 4294967024 }
 0x1a5   : > { %3187 = dma.done.wait (%p4292_p7), [#allocation21], 32   ;;  %p4293_p8 = pmov %p4288_p2 }
 0x1a6   : > { %p4294_p3 = pmov %p4288_p2 }
 0x1a7   : > { %3189 = vsyncadd (%p4293_p8), [#allocation21], 4294967264 }
 0x1a8   : > { %3191 = dma.done.wait (%p4294_p3), [#allocation24], 272   ;;  %p4295_p5 = pmov %p4288_p2 }
 0x1a9   : > { %p4296_p12 = pmov %p4288_p2 }
 0x1aa   : > { %3193 = vsyncadd (%p4295_p5), [#allocation24], 4294967024 }
 0x1ab   : > { %3195 = dma.done.wait (%p4296_p12), [#allocation27], 528   ;;  %p4297_p1 = pmov %p4288_p2 }
 0x1ac   : > { %v3241_v0 = vmov 0.0   ;;  %vm3242_vm0 = vmmov 0   ;;  %v2678_v1 = vld [vmem:[#allocation14] sm:$0xff]   ;;  %v2679_v2 = vld [vmem:[#allocation14 + $0x8] sm:$0xff]   ;;  %s3243_s16 = smov 96   ;;  %v2682_v5 = vld [vmem:[%s594_s13] sm:$0xff]  }
 0x1ad   : > { %3197 = vsyncadd (%p4297_p1), [#allocation27], 4294966768  ;;  %2379 = vmatprep.subr.bf16.mxu1 %v3241_v0  ;;  %2383 = vmatprep.mubr.msk.bf16.mxu1 %vm3242_vm0, %v3241_v0  ;;  %v2680_v3 = vld [vmem:[#allocation14] sm:$0xff]   ;;  %v2681_v4 = vld [vmem:[#allocation14 + $0x8] sm:$0xff]   ;;  %vm744_vm1 = vcmask 261120   ;;  %vm790_vm2 = vcmask 64512  }
 0x1ae   : > { %2395 = vmatprep.subr.bf16.mxu0 %v3241_v0  ;;  %2397 = vmatprep.mubr.msk.bf16.mxu0 %vm3242_vm0, %v3241_v0  ;;  %v2304_v6 = vld [vmem:[#allocation16] ss:$0 sm:$0xff]  ;;  %825 = vst.msk [vmem:[#allocation7] sm:$0xff] %vm790_vm2, %v3241_v0  ;;  %826 = vst.msk [vmem:[#allocation7 + $0x8] sm:$0xff] %vm790_vm2, %v3241_v0  ;;  %v2683_v9 = vld [vmem:[%s603_s11] sm:$0xff]   ;;  %s3244_s14 = smov 112  }
 0x1af   : > { %860 = vrot.lane.b32.xlu0 %v2678_v1, %s3243_s16  ;;  %2380 = vmatpush3.bf16.msra.mxu1 %v2680_v3  ;;  %827 = vst.msk [vmem:[#allocation7 + $0x10] sm:$0xff] %vm790_vm2, %v3241_v0  ;;  %828 = vst.msk [vmem:[#allocation7 + $0x18] sm:$0xff] %vm790_vm2, %v3241_v0  ;;  %s3245_s0 = smov 120   ;;  %s3246_s15 = smov 104   ;;  %v2343_v43 = vld [vmem:[%s612_s30] sm:$0xff]   ;;  %vm1180_vm3 = vcmask 130048  }
 0x1b0   : > { %2381 = vmatprep.subr.bf16.mxu1 %v3241_v0  ;;  %866 = vrot.lane.b32.xlu1 %v2304_v6, %s3243_s16  ;;  %829 = vst.msk [vmem:[#allocation7 + $0x20] sm:$0xff] %vm790_vm2, %v3241_v0  ;;  %830 = vst.msk [vmem:[#allocation7 + $0x28] sm:$0xff] %vm790_vm2, %v3241_v0  ;;  %v3874_v44 = vunpack.c.l.bf16 %v2343_v43  ;;  %v3876_v48 = vunpack.c.h.bf16 %v2343_v43  ;;  %vm808_vm4 = vcmask 7168   ;;  %v3247_v53 = vmov -inf   ;;  %s3249_s4 = smov 88   ;;  %s3250_s29 = smov 72  }
 0x1b1   : > { %831 = vst.msk [vmem:[#allocation7 + $0x30] sm:$0xff] %vm790_vm2, %v3241_v0  ;;  %832 = vst.msk [vmem:[#allocation7 + $0x38] sm:$0xff] %vm790_vm2, %v3241_v0  ;;  %v3248_v57 = vmov 0   ;;  %s3251_s21 = smov 80   ;;  %s3252_s28 = smov 8   ;;  %vm1727_vm5 = vcmask 195584  }
 0x1b2   : > { %809 = vst.msk [vmem:[#allocation5] sm:$0xff] %vm808_vm4, %v3247_v53  ;;  %810 = vst.msk [vmem:[#allocation5 + $0x8] sm:$0xff] %vm808_vm4, %v3247_v53  ;;  %2661 = vset.pattern.permute.xlu0 %v3248_v57  ;;  %2662 = vset.pattern.permute.xlu1 %v3248_v57  ;;  %s3253_s24 = smov 16   ;;  %s3254_s12 = smov 24   ;;  %vm1961_vm6 = vcmask 523264  }
 0x1b3   : > { %862 = vrot.lane.b32.xlu0 %v2679_v2, %s3243_s16  ;;  %2382 = vmatpush3.bf16.msra.mxu1 %v2681_v4  ;;  %811 = vst.msk [vmem:[#allocation5 + $0x10] sm:$0xff] %vm808_vm4, %v3247_v53  ;;  %812 = vst.msk [vmem:[#allocation5 + $0x18] sm:$0xff] %vm808_vm4, %v3247_v53  ;;  %s4298_s7 = sld [smem:[#allocation38_spill]]  ;;  %s2298_s18 = sshll.u32 %s3761_s19, 4 }
 0x1b4   : > { %2387 = vmatprep.subr.bf16.mxu1 %v3241_v0  ;;  %813 = vst.msk [vmem:[#allocation5 + $0x20] sm:$0xff] %vm808_vm4, %v3247_v53  ;;  %814 = vst.msk [vmem:[#allocation5 + $0x28] sm:$0xff] %vm808_vm4, %v3247_v53  ;;  %s704_s23 = scalar_lea.vmem [#allocation29], %s2298_s18  ;;  %s4299_s9 = sld [smem:[#allocation56_spill]] }
 0x1b5   : > { %815 = vst.msk [vmem:[#allocation5 + $0x30] sm:$0xff] %vm808_vm4, %v3247_v53  ;;  %816 = vst.msk [vmem:[#allocation5 + $0x38] sm:$0xff] %vm808_vm4, %v3247_v53  ;;  %s2026_s3 = sshll.u32 %s704_s23, 4  ;;  %s2011_s11 = scalar_lea.sflag [#allocation10], %s3761_s19  ;;  %s4143_s3 = int_to_ptr.vmem [resolvable:$true] %s2026_s3 }
 0x1b6   : > { %2384 = vmatmul.mubr.msk.bf16.vlgmr.msra.gmra.mrb[0].mxu1 %vm744_vm1, %v2682_v5  ;;  %817 = vst.msk [vmem:[#allocation6] sm:$0xff] %vm808_vm4, %v3241_v0  ;;  %818 = vst.msk [vmem:[#allocation6 + $0x8] sm:$0xff] %vm808_vm4, %v3241_v0  ;;  %s3118_s30 = scalar_lea.vmem %s4143_s3, 256  ;;  %p4300_p10 = scmp.ne.s32.totalorder %s4266_s17, 0 }
 0x1b7   : > { %2391 = vmatprep.mubr.msk.bf16.mxu1 %vm3242_vm0, %v3241_v0  ;;  %819 = vst.msk [vmem:[#allocation6 + $0x10] sm:$0xff] %vm808_vm4, %v3241_v0  ;;  %820 = vst.msk [vmem:[#allocation6 + $0x18] sm:$0xff] %vm808_vm4, %v3241_v0  ;;  %p3119_p9 = scmp.ne.s32.totalorder %s4143_s3, %s3118_s30 }
 0x1b8   : > { %821 = vst.msk [vmem:[#allocation6 + $0x20] sm:$0xff] %vm808_vm4, %v3241_v0  ;;  %822 = vst.msk [vmem:[#allocation6 + $0x28] sm:$0xff] %vm808_vm4, %v3241_v0 }
 0x1b9   : > { %823 = vst.msk [vmem:[#allocation6 + $0x30] sm:$0xff] %vm808_vm4, %v3241_v0  ;;  %824 = vst.msk [vmem:[#allocation6 + $0x38] sm:$0xff] %vm808_vm4, %v3241_v0  ;;  %s2341_s22 = sshll.u32 %s4298_s7, 8  ;;  %p3120_p6 = pnand %p3119_p9, %p4300_p10 }
 0x1ba   : > { %s4139_s2 = scalar_lea.hbm %s4299_s9, %s2341_s22 }
 0x1bb   : > { %v3981_v43 = vld [vmem:[#allocation5 + $0x28] sm:$0xff]  ;;  %p3121_p0 = pneg %p3120_p6 }
 0x221   : > { %v861_v7 = vpop.permute.xlu0 %860 }
 0x222   : > { %2388 = vmatpush3.bf16.msra.mxu1 %v861_v7  ;;  %v867_v17 = vpop.permute.xlu1 %866 }
 0x223   : > { %2389 = vmatprep.subr.bf16.mxu1 %v3241_v0 }
 0x225   : > { %v863_v8 = vpop.permute.xlu0 %862 }
 0x226   : > { %2390 = vmatpush3.bf16.msra.mxu1 %v863_v8 }
 0x227   : > { %2401 = vmatprep.subr.bf16.mxu1 %v3241_v0 }
 0x229   : > { %2392 = vmatmul.mubr.msk.bf16.vlgmr.msra.gmra.mrb[4].mxu1 %vm744_vm1, %v2683_v9 }
 0x22a   : > { %2403 = vmatprep.mubr.msk.bf16.mxu1 %vm3242_vm0, %v3241_v0 }
 0x289   : > { %v782_v10 = vpop.f32.mrb[0].mxu1 }
 0x28a   : > { %v783_v11 = vadd.f32 %v2304_v6, %v782_v10  ;;  %v2385_v12 = vpop.f32.mrb[1].mxu1 }
 0x28b   : > { %v785_v13 = vpop.f32.mrb[2].mxu1 }
 0x28c   : > { %v786_v14 = vadd.f32 %v2304_v6, %v785_v13  ;;  %v2386_v15 = vpop.f32.mrb[3].mxu1 }
 0x28e   : > { %v789_v16 = vpack.c.bf16 %v786_v14, %v783_v11 }
 0x290   : > { %791 = vst.msk [vmem:[#allocation2] sm:$0xff] %vm790_vm2, %v789_v16 }
 0x297   : > { %v952_v27 = vld [vmem:[#allocation2] sm:$0xff] }
 0x2fc   : > { %v907_v18 = vpop.f32.mrb[4].mxu1 }
 0x2fd   : > { %v2393_v19 = vpop.f32.mrb[5].mxu1  ;;  %v908_v21 = vadd.f32 %v907_v18, %v867_v17 }
 0x2fe   : > { %v910_v20 = vpop.f32.mrb[6].mxu1 }
 0x2ff   : > { %v911_v22 = vadd.f32 %v910_v20, %v867_v17  ;;  %v2394_v23 = vpop.f32.mrb[7].mxu1 }
 0x301   : > { %v3839_v24 = vpack.c.bf16 %v911_v22, %v908_v21 }
 0x303   : > { %916 = vst.msk [vmem:[#allocation3] sm:$0xff] %vm790_vm2, %v3839_v24  ;;  %932 = vrot.lane.b32.xlu0 %v3839_v24, %s3244_s14  ;;  %922 = vrot.lane.b32.xlu1 %v3839_v24, %s3245_s0 }
 0x307   : > { %942 = vrot.lane.b32.xlu0 %v3839_v24, %s3246_s15  ;;  %793 = vrot.lane.b32.xlu1 %v789_v16, %s3245_s0 }
 0x30a   : > { %v956_v25 = vld [vmem:[#allocation3] sm:$0xff] }
 0x30b   : > { %803 = vrot.lane.b32.xlu0 %v789_v16, %s3246_s15  ;;  %798 = vrot.lane.b32.xlu1 %v789_v16, %s3244_s14  ;;  %v968_v26 = vsel %vm790_vm2, %v956_v25, 0 }
 0x30c   : > { %2396 = vmatpush3.bf16.xpose.msra.mxu0 %v968_v26  ;;  %v3942_v26 = vld [vmem:[#allocation5] sm:$0xff] }
 0x30d   : > { %2407 = vmatprep.subr.bf16.mxu0 %v3241_v0 }
 0x313   : > { %2398 = vmatmul.mubr.msk.bf16.vlgmr.msra.gmra.mrb[0].mxu0 %vm790_vm2, %v952_v27 }
 0x314   : > { %2409 = vmatprep.mubr.msk.bf16.mxu0 %vm3242_vm0, %v3241_v0 }
 0x375   : > { %v933_v28 = vpop.permute.xlu0 %932  ;;  %v923_v29 = vpop.permute.xlu1 %922 }
 0x376   : > { %936 = vst.msk [vmem:[#allocation3 + $0x10] sm:$0xff] %vm790_vm2, %v933_v28  ;;  %926 = vst.msk [vmem:[#allocation3 + $0x8] sm:$0xff] %vm790_vm2, %v923_v29  ;;  %v3944_v28 = vld [vmem:[#allocation5 + $0x8] sm:$0xff] }
 0x379   : > { %v943_v30 = vpop.permute.xlu0 %942  ;;  %v794_v31 = vpop.permute.xlu1 %793 }
 0x37a   : > { %946 = vst.msk [vmem:[#allocation3 + $0x18] sm:$0xff] %vm790_vm2, %v943_v30  ;;  %797 = vst.msk [vmem:[#allocation2 + $0x8] sm:$0xff] %vm790_vm2, %v794_v31 }
 0x37d   : > { %v804_v32 = vpop.permute.xlu0 %803  ;;  %v799_v33 = vpop.permute.xlu1 %798  ;;  %v957_v34 = vld [vmem:[#allocation3 + $0x8] sm:$0xff]  ;;  %v958_v35 = vld [vmem:[#allocation3 + $0x10] sm:$0xff] }
 0x37e   : > { %807 = vst.msk [vmem:[#allocation2 + $0x18] sm:$0xff] %vm790_vm2, %v804_v32  ;;  %802 = vst.msk [vmem:[#allocation2 + $0x10] sm:$0xff] %vm790_vm2, %v799_v33  ;;  %v1015_v36 = vsel %vm790_vm2, %v957_v34, 0  ;;  %v1062_v37 = vsel %vm790_vm2, %v958_v35, 0  ;;  %v3964_v34 = vld [vmem:[#allocation5 + $0x10] sm:$0xff] }
 0x37f   : > { %2402 = vmatpush3.bf16.xpose.msra.mxu1 %v1015_v36  ;;  %2408 = vmatpush3.bf16.xpose.msra.mxu0 %v1062_v37  ;;  %v3966_v36 = vld [vmem:[#allocation5 + $0x18] sm:$0xff] }
 0x380   : > { %2413 = vmatprep.subr.bf16.mxu1 %v3241_v0  ;;  %2419 = vmatprep.subr.bf16.mxu0 %v3241_v0 }
 0x381   : > { %v959_v38 = vld [vmem:[#allocation3 + $0x18] sm:$0xff]  ;;  %v953_v39 = vld [vmem:[#allocation2 + $0x8] sm:$0xff] }
 0x382   : > { %v1109_v41 = vsel %vm790_vm2, %v959_v38, 0 }
 0x385   : > { %v954_v40 = vld [vmem:[#allocation2 + $0x10] sm:$0xff]  ;;  %v955_v42 = vld [vmem:[#allocation2 + $0x18] sm:$0xff] }
 0x386   : > { %2404 = vmatmul.mubr.msk.bf16.vlgmr.msra.gmra.mrb[8].mxu1 %vm790_vm2, %v953_v39  ;;  %2410 = vmatmul.mubr.msk.bf16.vlgmr.msra.gmra.mrb[4].mxu0 %vm790_vm2, %v954_v40  ;;  %v3971_v39 = vld [vmem:[#allocation5 + $0x20] sm:$0xff] }
 0x387   : > { %2414 = vmatpush3.bf16.xpose.msra.mxu1 %v1109_v41  ;;  %2415 = vmatprep.mubr.msk.bf16.mxu1 %vm3242_vm0, %v3241_v0 }
 0x388   : > { %2425 = vmatprep.subr.bf16.mxu1 %v3241_v0  ;;  %2421 = vmatprep.mubr.msk.bf16.mxu0 %vm3242_vm0, %v3241_v0 }
 0x38e   : > { %2416 = vmatmul.mubr.msk.bf16.vlgmr.msra.gmra.mrb[12].mxu1 %vm790_vm2, %v955_v42 }
 0x38f   : > { %2427 = vmatprep.mubr.msk.bf16.mxu1 %vm3242_vm0, %v3241_v0 }
 0x3e6   : > { %v1004_v45 = vpop.f32.mrb[0].mxu0 }
 0x3e7   : > { %v1152_v46 = vmul.f32 0.35355338, %v1004_v45  ;;  %v2399_v47 = vpop.f32.mrb[1].mxu0 }
 0x3e8   : > { %v1007_v49 = vpop.f32.mrb[2].mxu0  ;;  %v3990_v47 = vld [vmem:[#allocation5 + $0x30] sm:$0xff] }
 0x3e9   : > { %v1153_v50 = vmul.f32 0.35355338, %v1007_v49  ;;  %v2400_v51 = vpop.f32.mrb[3].mxu0  ;;  %v3879_v52 = vadd.f32 %v3874_v44, %v1152_v46 }
 0x3ea   : > { %v4000_v51 = vld [vmem:[#allocation5 + $0x38] sm:$0xff] }
 0x3eb   : > { %v1181_v54 = vsel %vm1180_vm3, %v3879_v52, -inf  ;;  %v3908_v55 = vadd.f32 %v3876_v48, %v1153_v50 }
 0x3ec   : > { %1182 = vmax.xlane.f32.xlu1 %v1181_v54 }
 0x3ed   : > { %v1184_v56 = vsel %vm1180_vm3, %v3908_v55, -inf }
 0x3ee   : > { %1185 = vmax.xlane.f32.xlu0 %v1184_v56 }
 0x459   : > { %v1051_v58 = vpop.f32.mrb[8].mxu1  ;;  %v1098_v59 = vpop.f32.mrb[4].mxu0 }
 0x45a   : > { %v1154_v60 = vmul.f32 0.35355338, %v1051_v58  ;;  %v1156_v61 = vmul.f32 0.35355338, %v1098_v59  ;;  %v2405_v62 = vpop.f32.mrb[9].mxu1  ;;  %v2411_v63 = vpop.f32.mrb[5].mxu0 }
 0x45b   : > { %v1054_v1 = vpop.f32.mrb[10].mxu1  ;;  %v1101_v2 = vpop.f32.mrb[6].mxu0 }
 0x45c   : > { %v1155_v3 = vmul.f32 0.35355338, %v1054_v1  ;;  %v1157_v4 = vmul.f32 0.35355338, %v1101_v2  ;;  %v2406_v5 = vpop.f32.mrb[11].mxu1  ;;  %v2412_v6 = vpop.f32.mrb[7].mxu0  ;;  %v3913_v7 = vadd.f32 %v3874_v44, %v1154_v60  ;;  %v3921_v10 = vadd.f32 %v3874_v44, %v1156_v61 }
 0x45e   : > { %v1187_v8 = vsel %vm1180_vm3, %v3913_v7, -inf  ;;  %v3918_v9 = vadd.f32 %v3876_v48, %v1155_v3  ;;  %v3926_v12 = vadd.f32 %v3876_v48, %v1157_v4  ;;  %v1193_v16 = vsel %vm1180_vm3, %v3921_v10, -inf }
 0x45f   : > { %1188 = vmax.xlane.f32.xlu0 %v1187_v8 }
 0x460   : > { %v1190_v11 = vsel %vm1180_vm3, %v3918_v9, -inf  ;;  %v1196_v20 = vsel %vm1180_vm3, %v3926_v12, -inf }
 0x461   : > { %1191 = vmax.xlane.f32.xlu1 %v1190_v11  ;;  %v1145_v13 = vpop.f32.mrb[12].mxu1 }
 0x462   : > { %v1158_v14 = vmul.f32 0.35355338, %v1145_v13  ;;  %v2417_v15 = vpop.f32.mrb[13].mxu1 }
 0x463   : > { %1194 = vmax.xlane.f32.xlu0 %v1193_v16  ;;  %v1148_v17 = vpop.f32.mrb[14].mxu1 }
 0x464   : > { %v1159_v18 = vmul.f32 0.35355338, %v1148_v17  ;;  %v2418_v19 = vpop.f32.mrb[15].mxu1  ;;  %v3933_v21 = vadd.f32 %v3874_v44, %v1158_v14 }
 0x465   : > { %1197 = vmax.xlane.f32.xlu1 %v1196_v20 }
 0x466   : > { %v1199_v22 = vsel %vm1180_vm3, %v3933_v21, -inf  ;;  %v3938_v23 = vadd.f32 %v3876_v48, %v1159_v18 }
 0x467   : > { %1200 = vmax.xlane.f32.xlu0 %v1199_v22 }
 0x468   : > { %v1202_v25 = vsel %vm1180_vm3, %v3938_v23, -inf }
 0x469   : > { %1203 = vmax.xlane.f32.xlu1 %v1202_v25 }
 0x479   : > { %v1183_v27 = vpop.xlane.xlu1 %1182 }
 0x47a   : > { %v3947_v29 = vmax.f32 %v3942_v26, %v1183_v27 }
 0x47b   : > { %v1186_v30 = vpop.xlane.xlu0 %1185 }
 0x47c   : > { %v1213_v31 = vsub.f32 %v3942_v26, %v3947_v29  ;;  %1610 = vst.msk [vmem:[#allocation5] sm:$0xff] %vm808_vm4, %v3947_v29  ;;  %v3954_v32 = vmax.f32 %v3944_v28, %v1186_v30 }
 0x47d   : > { %1239 = vperm.xlu0 %2661, %v3947_v29  }
 0x47e   : > { %v1214_v33 = vsub.f32 %v3944_v28, %v3954_v32  ;;  %1611 = vst.msk [vmem:[#allocation5 + $0x8] sm:$0xff] %vm808_vm4, %v3954_v32  ;;  %1244 = vperm.xlu1 %2662, %v3954_v32  }
 0x481   : > { %927 = vrot.lane.b32.xlu0 %v3839_v24, %s3249_s4 }
 0x485   : > { %947 = vrot.lane.b32.xlu0 %v3839_v24, %s3250_s29 }
 0x4ec   : > { %v1189_v35 = vpop.xlane.xlu0 %1188 }
 0x4ed   : > { %v3969_v37 = vmax.f32 %v3964_v34, %v1189_v35 }
 0x4ee   : > { %v1192_v38 = vpop.xlane.xlu1 %1191 }
 0x4ef   : > { %v1215_v40 = vsub.f32 %v3964_v34, %v3969_v37  ;;  %1612 = vst.msk [vmem:[#allocation5 + $0x10] sm:$0xff] %vm808_vm4, %v3969_v37  ;;  %v3978_v41 = vmax.f32 %v3966_v36, %v1192_v38  ;;  %1249 = vperm.xlu1 %2662, %v3969_v37  }
 0x4f0   : > { %v1195_v42 = vpop.xlane.xlu0 %1194 }
 0x4f1   : > { %v1216_v44 = vsub.f32 %v3966_v36, %v3978_v41  ;;  %1613 = vst.msk [vmem:[#allocation5 + $0x18] sm:$0xff] %vm808_vm4, %v3978_v41  ;;  %v3988_v45 = vmax.f32 %v3971_v39, %v1195_v42 }
 0x4f2   : > { %v1198_v46 = vpop.xlane.xlu1 %1197 }
 0x4f3   : > { %v1217_v48 = vsub.f32 %v3971_v39, %v3988_v45  ;;  %1614 = vst.msk [vmem:[#allocation5 + $0x20] sm:$0xff] %vm808_vm4, %v3988_v45  ;;  %v3997_v49 = vmax.f32 %v3981_v43, %v1198_v46  ;;  %1259 = vperm.xlu1 %2662, %v3988_v45  }
 0x4f4   : > { %v1201_v50 = vpop.xlane.xlu0 %1200 }
 0x4f5   : > { %v1218_v53 = vsub.f32 %v3981_v43, %v3997_v49  ;;  %1615 = vst.msk [vmem:[#allocation5 + $0x28] sm:$0xff] %vm808_vm4, %v3997_v49  ;;  %v4007_v54 = vmax.f32 %v3990_v47, %v1201_v50 }
 0x4f6   : > { %v1204_v56 = vpop.xlane.xlu1 %1203 }
 0x4f7   : > { %v1219_v57 = vsub.f32 %v3990_v47, %v4007_v54  ;;  %1616 = vst.msk [vmem:[#allocation5 + $0x30] sm:$0xff] %vm808_vm4, %v4007_v54  ;;  %v4014_v58 = vmax.f32 %v4000_v51, %v1204_v56  ;;  %1254 = vperm.xlu1 %2662, %v3978_v41   ;;  %v1231_v36 = vmul.f32 1.442695, %v1218_v53  ;;  %v1303_v47 = vld [vmem:[#allocation6 + $0x10] sm:$0xff]  ;;  %v1305_v53 = vld [vmem:[#allocation6 + $0x20] sm:$0xff] }
 0x4f9   : > { %v1220_v59 = vsub.f32 %v4000_v51, %v4014_v58  ;;  %1617 = vst.msk [vmem:[#allocation5 + $0x38] sm:$0xff] %vm808_vm4, %v4014_v58  ;;  %v1233_v34 = vmul.f32 1.442695, %v1219_v57 }
 0x4fb   : > { %1264 = vperm.xlu1 %2662, %v3997_v49   ;;  %v1235_v37 = vmul.f32 1.442695, %v1220_v59  ;;  %v1304_v59 = vld [vmem:[#allocation6 + $0x18] sm:$0xff] }
 0x4fc   : > { %v1240_v60 = vpop.permute.xlu0 %1239 }
 0x4fd   : > { %v1245_v1 = vpop.permute.xlu1 %1244  ;;  %v1277_v14 = vsub.f32 %v3879_v52, %v1240_v60 }
 0x4fe   : > { %v1278_v16 = vsub.f32 %v3908_v55, %v1245_v1 }
 0x4ff   : > { %1269 = vperm.xlu1 %2662, %v4007_v54   ;;  %v1285_v18 = vmul.f32 1.442695, %v1277_v14  ;;  %v1227_v14 = vmul.f32 1.442695, %v1216_v44  ;;  %v1221_v54 = vmul.f32 1.442695, %v1213_v31 }
 0x500   : > { %v928_v61 = vpop.permute.xlu0 %927  ;;  %v1287_v20 = vmul.f32 1.442695, %v1278_v16  ;;  %v1229_v16 = vmul.f32 1.442695, %v1217_v48 }
 0x501   : > { %931 = vst.msk [vmem:[#allocation4 + $0x8] sm:$0xff] %vm790_vm2, %v928_v61 }
 0x503   : > { %1274 = vperm.xlu1 %2662, %v4014_v58  }
 0x504   : > { %v948_v62 = vpop.permute.xlu0 %947 }
 0x505   : > { %951 = vst.msk [vmem:[#allocation4 + $0x18] sm:$0xff] %vm790_vm2, %v948_v62 }
 0x507   : > { %918 = vrot.lane.b32.xlu1 %v3839_v24, %s3243_s16  ;;  %s3255_s16 = smov [#allocation29]  }
 0x508   : > { %v961_v63 = vld [vmem:[#allocation4 + $0x8] sm:$0xff]  ;;  %s3122_s14 = sshll.u32 %s3255_s16, 4  ;;  %s3123_s14 = int_to_ptr.vmem [resolvable:$false] %s3122_s14 }
 0x509   : > { %2426 = vmatpush3.bf16.msra.mxu1 %v961_v63  ;;  %s3124_s0 = scalar_lea.vmem %s3123_s14, 512  ;;  %p3125_p2 = scmp.lt.s32.totalorder %s4143_s3, %s3123_s14 }
 0x50a   : > { %2437 = vmatprep.subr.bf16.mxu1 %v3241_v0  ;;  %p3126_p11 = scmp.lt.s32.totalorder %s3124_s0, %s3118_s30 }
 0x50b   : > { %937 = vrot.lane.b32.xlu1 %v3839_v24, %s3251_s21 }
 0x50c   : > { %p3127_p13 = por %p3126_p11, %p3125_p2 }
 0x50e   : > { %p3128_p4 = pnand %p3127_p13, %p3121_p0 }
 0x56e   : > { %v1250_v2 = vpop.permute.xlu1 %1249 }
 0x56f   : > { %v1279_v3 = vsub.f32 %v3913_v7, %v1250_v2 }
 0x571   : > { %v1289_v4 = vmul.f32 1.442695, %v1279_v3 }
 0x572   : > { %v1260_v5 = vpop.permute.xlu1 %1259 }
 0x573   : > { %2692 = vpow2.f32 %v1289_v4  ;;  %v1281_v6 = vsub.f32 %v3921_v10, %v1260_v5 }
 0x575   : > { %v1293_v8 = vmul.f32 1.442695, %v1281_v6 }
 0x576   : > { %v1255_v11 = vpop.permute.xlu1 %1254 }
 0x577   : > { %2694 = vpow2.f32 %v1293_v8  ;;  %v1280_v13 = vsub.f32 %v3918_v9, %v1255_v11 }
 0x579   : > { %v1291_v15 = vmul.f32 1.442695, %v1280_v13 }
 0x57a   : > { %v1265_v24 = vpop.permute.xlu1 %1264 }
 0x57b   : > { %2696 = vpow2.f32 %v1291_v15  ;;  %v1282_v17 = vsub.f32 %v3926_v12, %v1265_v24  ;;  %v1225_v15 = vmul.f32 1.442695, %v1215_v40 }
 0x57d   : > { %v2693_v7 = vpop.eup %2692  ;;  %v1295_v19 = vmul.f32 1.442695, %v1282_v17  ;;  %v1223_v17 = vmul.f32 1.442695, %v1214_v33 }
 0x57e   : > { %v1270_v22 = vpop.permute.xlu1 %1269  ;;  %v1323_v10 = vsel %vm1180_vm3, %v2693_v7, 0.0 }
 0x57f   : > { %2698 = vpow2.f32 %v1295_v19  ;;  %v1283_v25 = vsub.f32 %v3933_v21, %v1270_v22  ;;  %1324 = vadd.xlane.f32.xlu1 %v1323_v10  ;;  %v963_v21 = vld [vmem:[#allocation4 + $0x18] sm:$0xff]  ;;  %v1306_v19 = vld [vmem:[#allocation6 + $0x28] sm:$0xff]  ;;  %v1307_v22 = vld [vmem:[#allocation6 + $0x30] sm:$0xff] }
 0x580   : > { %2700 = vpow2.f32 %v1285_v18 }
 0x581   : > { %v2695_v9 = vpop.eup %2694  ;;  %v1297_v52 = vmul.f32 1.442695, %v1283_v25  ;;  %2702 = vpow2.f32 %v1287_v20 }
 0x582   : > { %v1275_v55 = vpop.permute.xlu1 %1274  ;;  %v1329_v27 = vsel %vm1180_vm3, %v2695_v9, 0.0 }
 0x583   : > { %2704 = vpow2.f32 %v1297_v52  ;;  %v1284_v12 = vsub.f32 %v3938_v23, %v1275_v55  ;;  %1330 = vadd.xlane.f32.xlu0 %v1329_v27  ;;  %v1308_v52 = vld [vmem:[#allocation6 + $0x38] sm:$0xff] }
 0x585   : > { %v2697_v30 = vpop.eup %2696  ;;  %v1299_v35 = vmul.f32 1.442695, %v1284_v12 }
 0x586   : > { %v919_v38 = vpop.permute.xlu1 %918  ;;  %v1326_v42 = vsel %vm1180_vm3, %v2697_v30, 0.0  ;;  %v1415_v46 = vpack.c.bf16 %v2697_v30, %v2693_v7 }
 0x587   : > { %2706 = vpow2.f32 %v1299_v35  ;;  %921 = vst.msk [vmem:[#allocation4] sm:$0xff] %vm790_vm2, %v919_v38  ;;  %1327 = vadd.xlane.f32.xlu0 %v1326_v42 }
 0x588   : > { %2428 = vmatmul.mubr.msk.bf16.vlgmr.msra.gmra.mrb[16].mxu1 %vm1180_vm3, %v1415_v46  ;;  %2708 = vpow2.f32 %v1227_v14  ;;  %v1302_v46 = vld [vmem:[#allocation6 + $0x8] sm:$0xff] }
 0x589   : > { %v2699_v50 = vpop.eup %2698  ;;  %2438 = vmatpush3.bf16.msra.mxu1 %v963_v21  ;;  %2439 = vmatprep.mubr.msk.bf16.mxu1 %vm3242_vm0, %v3241_v0  ;;  %2710 = vpow2.f32 %v1225_v15  ;;  %v1360_v15 = vld [vmem:[#allocation7 + $0x10] sm:$0xff] }
 0x58a   : > { %v938_v23 = vpop.permute.xlu1 %937  ;;  %v1332_v56 = vsel %vm1180_vm3, %v2699_v50, 0.0  ;;  %2451 = vmatprep.subr.bf16.mxu1 %v3241_v0  ;;  %v2701_v60 = vpop.eup %2700  ;;  %v1416_v13 = vpack.c.bf16 %v2699_v50, %v2695_v9  ;;  %2712 = vpow2.f32 %v1229_v16  ;;  %v1301_v9 = vld [vmem:[#allocation6] sm:$0xff] }
 0x58b   : > { %941 = vst.msk [vmem:[#allocation4 + $0x10] sm:$0xff] %vm790_vm2, %v938_v23  ;;  %1333 = vadd.xlane.f32.xlu1 %v1332_v56  ;;  %v2703_v61 = vpop.eup %2702  ;;  %v1317_v4 = vsel %vm1180_vm3, %v2701_v60, 0.0  ;;  %2714 = vpow2.f32 %v1231_v36 }
 0x58c   : > { %v1414_v2 = vpack.c.bf16 %v2703_v61, %v2701_v60  ;;  %v1320_v11 = vsel %vm1180_vm3, %v2703_v61, 0.0  ;;  %2716 = vpow2.f32 %v1233_v34  ;;  %v1361_v34 = vld [vmem:[#allocation7 + $0x18] sm:$0xff] }
 0x58d   : > { %v2705_v62 = vpop.eup %2704  ;;  %2718 = vpow2.f32 %v1235_v37 }
 0x58e   : > { %v1335_v63 = vsel %vm1180_vm3, %v2705_v62, 0.0  ;;  %v960_v1 = vld [vmem:[#allocation4] sm:$0xff]  ;;  %2720 = vpow2.f32 %v1221_v54  ;;  %v1365_v54 = vld [vmem:[#allocation7 + $0x38] sm:$0xff] }
 0x58f   : > { %1336 = vadd.xlane.f32.xlu0 %v1335_v63  ;;  %2420 = vmatpush3.bf16.msra.mxu0 %v960_v1  ;;  %2722 = vpow2.f32 %v1223_v17 }
 0x590   : > { %2431 = vmatprep.subr.bf16.mxu0 %v3241_v0 }
 0x591   : > { %v2707_v3 = vpop.eup %2706 }
 0x592   : > { %2422 = vmatmul.mubr.msk.bf16.vlgmr.msra.gmra.mrb[8].mxu0 %vm1180_vm3, %v1414_v2  ;;  %v1338_v5 = vsel %vm1180_vm3, %v2707_v3, 0.0  ;;  %v962_v6 = vld [vmem:[#allocation4 + $0x10] sm:$0xff]  ;;  %v1417_v8 = vpack.c.bf16 %v2707_v3, %v2705_v62  ;;  %v2709_v40 = vpop.eup %2708 }
 0x593   : > { %1318 = vadd.xlane.f32.xlu0 %v1317_v4  ;;  %1339 = vadd.xlane.f32.xlu1 %v1338_v5  ;;  %v2711_v39 = vpop.eup %2710  ;;  %v1312_v7 = vmul.f32 %v2709_v40, %v1304_v59 }
 0x594   : > { %2432 = vmatpush3.bf16.msra.mxu0 %v962_v6  ;;  %2440 = vmatmul.mubr.msk.bf16.vlgmr.msra.gmra.mrb[20].mxu1 %vm1180_vm3, %v1417_v8  ;;  %v2713_v41 = vpop.eup %2712  ;;  %v1311_v48 = vmul.f32 %v2711_v39, %v1303_v47 }
 0x595   : > { %2433 = vmatprep.mubr.msk.bf16.mxu0 %vm3242_vm0, %v3241_v0  ;;  %2443 = vmatprep.subr.bf16.mxu0 %v3241_v0  ;;  %v2715_v44 = vpop.eup %2714  ;;  %v1313_v57 = vmul.f32 %v2713_v41, %v1305_v53  ;;  %v1364_v53 = vld [vmem:[#allocation7 + $0x30] sm:$0xff] }
 0x596   : > { %2455 = vmatprep.mubr.msk.bf16.mxu1 %vm3242_vm0, %v3241_v0  ;;  %v2717_v43 = vpop.eup %2716  ;;  %v1314_v29 = vmul.f32 %v2715_v44, %v1306_v19 }
 0x597   : > { %1321 = vadd.xlane.f32.xlu1 %v1320_v11  ;;  %v2719_v45 = vpop.eup %2718  ;;  %v1315_v28 = vmul.f32 %v2717_v43, %v1307_v22 }
 0x598   : > { %v2721_v32 = vpop.eup %2720  ;;  %v1316_v30 = vmul.f32 %v2719_v45, %v1308_v52 }
 0x599   : > { %v1309_v12 = vmul.f32 %v2721_v32, %v1301_v9  ;;  %v2723_v35 = vpop.eup %2722 }
 0x59a   : > { %2434 = vmatmul.mubr.msk.bf16.vlgmr.msra.gmra.mrb[12].mxu0 %vm1180_vm3, %v1416_v13  ;;  %v1310_v60 = vmul.f32 %v2723_v35, %v1302_v46 }
 0x59b   : > { %2447 = vmatprep.mubr.msk.bf16.mxu0 %vm3242_vm0, %v3241_v0 }
 0x5a8   : > { %1383 = vperm.xlu1 %2662, %v2709_v40  }
 0x5a9   : > { %1378 = vperm.xlu0 %2661, %v2711_v39  }
 0x5ac   : > { %1388 = vperm.xlu1 %2662, %v2713_v41  }
 0x5ad   : > { %1393 = vperm.xlu0 %2661, %v2715_v44  }
 0x5b0   : > { %1398 = vperm.xlu1 %2662, %v2717_v43  }
 0x5b1   : > { %1403 = vperm.xlu0 %2661, %v2719_v45  }
 0x60c   : > { %v1325_v49 = vpop.xlane.xlu1 %1324 }
 0x60d   : > { %v1343_v51 = vadd.f32 %v1325_v49, %v1311_v48 }
 0x60f   : > { %1352 = vst.msk [vmem:[#allocation6 + $0x10] sm:$0xff] %vm808_vm4, %v1343_v51 }
 0x610   : > { %v1331_v58 = vpop.xlane.xlu0 %1330 }
 0x611   : > { %v1345_v24 = vadd.f32 %v1331_v58, %v1313_v57 }
 0x613   : > { %1354 = vst.msk [vmem:[#allocation6 + $0x20] sm:$0xff] %vm808_vm4, %v1345_v24 }
 0x614   : > { %v1328_v18 = vpop.xlane.xlu0 %1327 }
 0x615   : > { %v1344_v20 = vadd.f32 %v1328_v18, %v1312_v7 }
 0x616   : > { %v1643_v26 = vld [vmem:[#allocation6 + $0x10] sm:$0xff] }
 0x617   : > { %1353 = vst.msk [vmem:[#allocation6 + $0x18] sm:$0xff] %vm808_vm4, %v1344_v20  ;;  %2724 = vrcp.f32 %v1643_v26 }
 0x618   : > { %v1334_v31 = vpop.xlane.xlu1 %1333 }
 0x619   : > { %v1346_v10 = vadd.f32 %v1334_v31, %v1314_v29  ;;  %v1362_v29 = vld [vmem:[#allocation7 + $0x20] sm:$0xff] }
 0x61a   : > { %v1663_v25 = vld [vmem:[#allocation6 + $0x20] sm:$0xff] }
 0x61b   : > { %1355 = vst.msk [vmem:[#allocation6 + $0x28] sm:$0xff] %vm808_vm4, %v1346_v10  ;;  %2726 = vrcp.f32 %v1663_v25  ;;  %v1363_v25 = vld [vmem:[#allocation7 + $0x28] sm:$0xff] }
 0x61c   : > { %v1337_v33 = vpop.xlane.xlu0 %1336 }
 0x61d   : > { %v1347_v55 = vadd.f32 %v1337_v33, %v1315_v28 }
 0x61e   : > { %v1644_v27 = vld [vmem:[#allocation6 + $0x18] sm:$0xff] }
 0x61f   : > { %1356 = vst.msk [vmem:[#allocation6 + $0x30] sm:$0xff] %vm808_vm4, %v1347_v55  ;;  %2728 = vrcp.f32 %v1644_v27 }
 0x620   : > { %v1319_v38 = vpop.xlane.xlu0 %1318  ;;  %v1340_v42 = vpop.xlane.xlu1 %1339 }
 0x621   : > { %v2725_v21 = vpop.eup %2724  ;;  %v1341_v50 = vadd.f32 %v1319_v38, %v1309_v12  ;;  %v1348_v23 = vadd.f32 %v1340_v42, %v1316_v30 }
 0x622   : > { %1649 = vperm.xlu1 %2662, %v2725_v21   ;;  %v1664_v56 = vld [vmem:[#allocation6 + $0x28] sm:$0xff] }
 0x623   : > { %1350 = vst.msk [vmem:[#allocation6] sm:$0xff] %vm808_vm4, %v1341_v50  ;;  %1357 = vst.msk [vmem:[#allocation6 + $0x38] sm:$0xff] %vm808_vm4, %v1348_v23  ;;  %2730 = vrcp.f32 %v1664_v56 }
 0x624   : > { %v1322_v61 = vpop.xlane.xlu1 %1321 }
 0x625   : > { %v2727_v62 = vpop.eup %2726  ;;  %v1342_v63 = vadd.f32 %v1322_v61, %v1310_v60 }
 0x626   : > { %1669 = vperm.xlu1 %2662, %v2727_v62   ;;  %v1683_v1 = vld [vmem:[#allocation6 + $0x30] sm:$0xff] }
 0x627   : > { %1351 = vst.msk [vmem:[#allocation6 + $0x8] sm:$0xff] %vm808_vm4, %v1342_v63  ;;  %2732 = vrcp.f32 %v1683_v1 }
 0x628   : > { %v1379_v16 = vpop.permute.xlu0 %1378  ;;  %v1384_v36 = vpop.permute.xlu1 %1383 }
 0x629   : > { %v2729_v2 = vpop.eup %2728  ;;  %v1408_v37 = vmul.f32 %v1379_v16, %v1360_v15  ;;  %v1409_v39 = vmul.f32 %v1384_v36, %v1361_v34  ;;  %v1359_v36 = vld [vmem:[#allocation7 + $0x8] sm:$0xff] }
 0x62a   : > { %1654 = vperm.xlu0 %2661, %v2729_v2   ;;  %v1684_v3 = vld [vmem:[#allocation6 + $0x38] sm:$0xff]  ;;  %v1623_v4 = vld [vmem:[#allocation6] sm:$0xff]  ;;  %v2685_v2 = vld [vmem:[#allocation17 + $0x8] sm:$0xff]  }
 0x62b   : > { %2734 = vrcp.f32 %v1684_v3 }
 0x62c   : > { %2736 = vrcp.f32 %v1623_v4  ;;  %v1389_v43 = vpop.permute.xlu1 %1388  ;;  %v1394_v49 = vpop.permute.xlu0 %1393 }
 0x62d   : > { %v2731_v5 = vpop.eup %2730  ;;  %v1410_v28 = vmul.f32 %v1389_v43, %v1362_v29  ;;  %v1411_v33 = vmul.f32 %v1394_v49, %v1363_v25 }
 0x62e   : > { %1674 = vperm.xlu0 %2661, %v2731_v5   ;;  %v1624_v6 = vld [vmem:[#allocation6 + $0x8] sm:$0xff]  ;;  %v1358_v5 = vld [vmem:[#allocation7] sm:$0xff] }
 0x62f   : > { %2738 = vrcp.f32 %v1624_v6 }
 0x630   : > { %v1399_v51 = vpop.permute.xlu1 %1398  ;;  %v1404_v57 = vpop.permute.xlu0 %1403 }
 0x631   : > { %v2733_v8 = vpop.eup %2732  ;;  %v1412_v59 = vmul.f32 %v1399_v51, %v1364_v53  ;;  %v1413_v18 = vmul.f32 %v1404_v57, %v1365_v54 }
 0x632   : > { %1689 = vperm.xlu1 %2662, %v2733_v8  }
 0x635   : > { %v2735_v11 = vpop.eup %2734 }
 0x636   : > { %1368 = vperm.xlu1 %2662, %v2721_v32   ;;  %1694 = vperm.xlu0 %2661, %v2735_v11   ;;  %v2737_v13 = vpop.eup %2736 }
 0x639   : > { %v2739_v14 = vpop.eup %2738 }
 0x63a   : > { %1629 = vperm.xlu1 %2662, %v2737_v13   ;;  %1373 = vperm.xlu0 %2661, %v2723_v35   ;;  %v2684_v35 = vld [vmem:[#allocation17] sm:$0xff]  }
 0x63b   : > { %2444 = vmatpush3.bf16.msra.mxu0 %v2684_v35 }
 0x63c   : > { %2445 = vmatprep.subr.bf16.mxu0 %v3241_v0 }
 0x63e   : > { %1634 = vperm.xlu0 %2661, %v2739_v14  }
 0x63f   : > { %2446 = vmatpush3.bf16.msra.mxu0 %v2685_v2 }
 0x640   : > { %2459 = vmatprep.subr.bf16.mxu0 %v3241_v0 }
 0x65b   : > { %v1499_v40 = vpop.f32.mrb[16].mxu1 }
 0x65c   : > { %v1596_v41 = vadd.f32 %v1499_v40, %v1408_v37  ;;  %v2429_v44 = vpop.f32.mrb[17].mxu1 }
 0x65d   : > { %v1502_v45 = vpop.f32.mrb[18].mxu1 }
 0x65e   : > { %1604 = vst.msk [vmem:[#allocation7 + $0x10] sm:$0xff] %vm790_vm2, %v1596_v41  ;;  %v1597_v47 = vadd.f32 %v1502_v45, %v1409_v39  ;;  %v2430_v48 = vpop.f32.mrb[19].mxu1 }
 0x660   : > { %1605 = vst.msk [vmem:[#allocation7 + $0x18] sm:$0xff] %vm790_vm2, %v1597_v47 }
 0x665   : > { %v1455_v58 = vpop.f32.mrb[8].mxu0  ;;  %v1640_v38 = vld [vmem:[#allocation7 + $0x10] sm:$0xff] }
 0x666   : > { %v2423_v24 = vpop.f32.mrb[9].mxu0 }
 0x667   : > { %v4097_v17 = vpop.f32.mrb[10].mxu0  ;;  %v1587_v7 = vpop.f32.mrb[20].mxu1  ;;  %v1641_v46 = vld [vmem:[#allocation7 + $0x18] sm:$0xff] }
 0x668   : > { %v1600_v19 = vadd.f32 %v1587_v7, %v1412_v59  ;;  %v2424_v20 = vpop.f32.mrb[11].mxu0  ;;  %v2441_v26 = vpop.f32.mrb[21].mxu1 }
 0x669   : > { %v1590_v31 = vpop.f32.mrb[22].mxu1 }
 0x66a   : > { %1608 = vst.msk [vmem:[#allocation7 + $0x30] sm:$0xff] %vm790_vm2, %v1600_v19  ;;  %v1601_v22 = vadd.f32 %v1590_v31, %v1413_v18  ;;  %v2442_v10 = vpop.f32.mrb[23].mxu1 }
 0x66b   : > { %v2317_v10 = vld [vmem:[#allocation19] ss:$0 sm:$0xff] }
 0x66c   : > { %1609 = vst.msk [vmem:[#allocation7 + $0x38] sm:$0xff] %vm790_vm2, %v1601_v22 }
 0x66d   : > { %v1543_v32 = vpop.f32.mrb[12].mxu0 }
 0x66e   : > { %v1598_v9 = vadd.f32 %v1543_v32, %v1410_v28  ;;  %v2435_v52 = vpop.f32.mrb[13].mxu0 }
 0x66f   : > { %v1546_v55 = vpop.f32.mrb[14].mxu0 }
 0x670   : > { %1606 = vst.msk [vmem:[#allocation7 + $0x20] sm:$0xff] %vm790_vm2, %v1598_v9  ;;  %v1599_v27 = vadd.f32 %v1546_v55, %v1411_v33  ;;  %v2436_v12 = vpop.f32.mrb[15].mxu0 }
 0x671   : > { %v1680_v6 = vld [vmem:[#allocation7 + $0x30] sm:$0xff] }
 0x672   : > { %1607 = vst.msk [vmem:[#allocation7 + $0x28] sm:$0xff] %vm790_vm2, %v1599_v27 }
 0x673   : > { %v1681_v11 = vld [vmem:[#allocation7 + $0x38] sm:$0xff] }
 0x677   : > { %v1660_v60 = vld [vmem:[#allocation7 + $0x20] sm:$0xff] }
 0x679   : > { %v1661_v61 = vld [vmem:[#allocation7 + $0x28] sm:$0xff] }
 0x6a1   : > { %v1650_v30 = vpop.permute.xlu1 %1649 }
 0x6a2   : > { %v1657_v21 = vmul.f32 %v1650_v30, %v1640_v38 }
 0x6a5   : > { %v1670_v23 = vpop.permute.xlu1 %1669 }
 0x6a6   : > { %v1677_v63 = vmul.f32 %v1670_v23, %v1660_v60  ;;  %v2686_v60 = vld [vmem:[#allocation23] sm:$0xff]  }
 0x6a7   : > { %2452 = vmatpush3.bf16.msra.mxu1 %v2686_v60 }
 0x6a8   : > { %2453 = vmatprep.subr.bf16.mxu1 %v3241_v0 }
 0x6a9   : > { %v1655_v42 = vpop.permute.xlu0 %1654 }
 0x6aa   : > { %v1658_v50 = vmul.f32 %v1655_v42, %v1641_v46 }
 0x6ac   : > { %v2663_v56 = vpack.i.bf16 %v1658_v50, %v1657_v21 }
 0x6ad   : > { %v1675_v62 = vpop.permute.xlu0 %1674 }
 0x6ae   : > { %v1678_v1 = vmul.f32 %v1675_v62, %v1661_v61  ;;  %2664 = vrot.lane.b32.xlu1 %v2663_v56, %s3252_s28  ;;  %v2687_v61 = vld [vmem:[#allocation23 + $0x8] sm:$0xff]  }
 0x6af   : > { %2454 = vmatpush3.bf16.msra.mxu1 %v2687_v61 }
 0x6b0   : > { %v2668_v3 = vpack.i.bf16 %v1678_v1, %v1677_v63 }
 0x6b1   : > { %v1690_v4 = vpop.permute.xlu1 %1689 }
 0x6b2   : > { %2669 = vrot.lane.b32.xlu0 %v2668_v3, %s3253_s24  ;;  %v1697_v14 = vmul.f32 %v1690_v4, %v1680_v6 }
 0x6b5   : > { %v1695_v8 = vpop.permute.xlu0 %1694  ;;  %v1369_v13 = vpop.permute.xlu1 %1368 }
 0x6b6   : > { %v1698_v15 = vmul.f32 %v1695_v8, %v1681_v11  ;;  %v1406_v16 = vmul.f32 %v1369_v13, %v1358_v5  ;;  %v2321_v8 = vld [vmem:[#allocation20] ss:$0 sm:$0xff] }
 0x6b8   : > { %v2673_v34 = vpack.i.bf16 %v1698_v15, %v1697_v14  ;;  %v1594_v37 = vadd.f32 %v1455_v58, %v1406_v16  ;;  %v2322_v15 = vld [vmem:[#allocation22] ss:$0 sm:$0xff] }
 0x6b9   : > { %v1374_v40 = vpop.permute.xlu0 %1373  ;;  %v1630_v44 = vpop.permute.xlu1 %1629 }
 0x6ba   : > { %1602 = vst.msk [vmem:[#allocation7] sm:$0xff] %vm790_vm2, %v1594_v37  ;;  %v1407_v39 = vmul.f32 %v1374_v40, %v1359_v36  ;;  %2674 = vrot.lane.b32.xlu1 %v2673_v34, %s3254_s12  ;;  %v2688_v40 = vld [vmem:[#allocation26] sm:$0xff]  }
 0x6bc   : > { %v1595_v41 = vadd.f32 %v4097_v17, %v1407_v39  ;;  %v2689_v39 = vld [vmem:[#allocation26 + $0x8] sm:$0xff]  }
 0x6bd   : > { %v1635_v43 = vpop.permute.xlu0 %1634 }
 0x6be   : > { %1603 = vst.msk [vmem:[#allocation7 + $0x8] sm:$0xff] %vm790_vm2, %v1595_v41  ;;  %v2690_v41 = vld [vmem:[#allocation26 + $0x10] sm:$0xff]  }
 0x6c1   : > { %v1621_v48 = vld [vmem:[#allocation7] sm:$0xff] }
 0x6c2   : > { %v1637_v58 = vmul.f32 %v1630_v44, %v1621_v48  ;;  %v2691_v44 = vld [vmem:[#allocation26 + $0x18] sm:$0xff]  }
 0x6c5   : > { %v1622_v49 = vld [vmem:[#allocation7 + $0x8] sm:$0xff] }
 0x6c6   : > { %v1638_v59 = vmul.f32 %v1635_v43, %v1622_v49  ;;  %v2323_v43 = vld [vmem:[#allocation25] ss:$0 sm:$0xff] }
 0x720   : > { %v2665_v45 = vpop.permute.xlu1 %2664 }
 0x721   : > { %v2667_v53 = vunpack.i.h.bf16 %v2665_v45  ;;  %v2666_v51 = vunpack.i.l.bf16 %v2665_v45 }
 0x723   : > { %v1724_v7 = vsel %vm790_vm2, %v1638_v59, %v2667_v53  ;;  %v1723_v17 = vsel %vm790_vm2, %v1637_v58, %v2666_v51 }
 0x724   : > { %v2670_v47 = vpop.permute.xlu0 %2669 }
 0x725   : > { %v2672_v54 = vunpack.i.h.bf16 %v2670_v47  ;;  %v2671_v57 = vunpack.i.l.bf16 %v2670_v47 }
 0x727   : > { %v1725_v20 = vsel %vm1180_vm3, %v1723_v17, %v2671_v57  ;;  %v1726_v26 = vsel %vm1180_vm3, %v1724_v7, %v2672_v54 }
 0x72c   : > { %v2675_v24 = vpop.permute.xlu1 %2674 }
 0x72d   : > { %v2677_v18 = vunpack.i.h.bf16 %v2675_v24  ;;  %v2676_v19 = vunpack.i.l.bf16 %v2675_v24 }
 0x72f   : > { %v1729_v29 = vsel %vm1727_vm5, %v1726_v26, %v2677_v18  ;;  %v1728_v31 = vsel %vm1727_vm5, %v1725_v20, %v2676_v19  ;;  %v2327_v26 = vld [vmem:[#allocation28] ss:$0 sm:$0xff] }
 0x730   : > { %v1730_v22 = vpack.c.bf16 %v1729_v29, %v1728_v31 }
 0x732   : > { %2448 = vmatmul.mubr.msk.bf16.vlgmr.msra.gmra.mrb[16].mxu0 %vm744_vm1, %v1730_v22 }
 0x733   : > { %2467 = vmatprep.mubr.msk.bf16.mxu0 %vm3242_vm0, %v3241_v0  ;;  %2460 = vmatpush3.bf16.msra.mxu0 %v2688_v40 }
 0x734   : > { %2461 = vmatprep.subr.bf16.mxu0 %v3241_v0 }
 0x737   : > { %2462 = vmatpush3.bf16.msra.mxu0 %v2689_v39 }
 0x738   : > { %2463 = vmatprep.subr.bf16.mxu0 %v3241_v0 }
 0x73b   : > { %2464 = vmatpush3.bf16.msra.mxu0 %v2690_v41 }
 0x73c   : > { %2465 = vmatprep.subr.bf16.mxu0 %v3241_v0 }
 0x73f   : > { %2466 = vmatpush3.bf16.msra.mxu0 %v2691_v44 }
 0x805   : > { %v1791_v25 = vpop.f32.mrb[16].mxu0 }
 0x806   : > { %v4116_v28 = vadd.f32 %v2317_v10, %v1791_v25  ;;  %v2449_v32 = vpop.f32.mrb[17].mxu0 }
 0x807   : > { %v1794_v33 = vpop.f32.mrb[18].mxu0 }
 0x808   : > { %v4118_v9 = vadd.f32 %v2317_v10, %v1794_v33  ;;  %v2450_v52 = vpop.f32.mrb[19].mxu0  ;;  %v1798_v55 = vsel %vm744_vm1, %v4116_v28, 0.0 }
 0x809   : > { %1799 = vadd.xlane.f32.xlu0 %v1798_v55 }
 0x80a   : > { %v1801_v27 = vsel %vm744_vm1, %v4118_v9, 0.0 }
 0x80b   : > { %1802 = vadd.xlane.f32.xlu1 %v1801_v27 }
 0x896   : > { %v1800_v12 = vpop.xlane.xlu0 %1799 }
 0x897   : > { %v1805_v30 = vmul.f32 0.03125, %v1800_v12 }
 0x898   : > { %v1803_v35 = vpop.xlane.xlu1 %1802 }
 0x899   : > { %v1807_v38 = vsub.f32 %v4116_v28, %v1805_v30  ;;  %v1806_v42 = vmul.f32 0.03125, %v1803_v35 }
 0x89b   : > { %v1808_v46 = vsub.f32 %v4118_v9, %v1806_v42  ;;  %v1809_v21 = vmul.f32 %v1807_v38, %v1807_v38 }
 0x89d   : > { %v1811_v50 = vsel %vm744_vm1, %v1809_v21, 0.0  ;;  %v1810_v23 = vmul.f32 %v1808_v46, %v1808_v46 }
 0x89e   : > { %1812 = vadd.xlane.f32.xlu0 %v1811_v50 }
 0x89f   : > { %v1814_v56 = vsel %vm744_vm1, %v1810_v23, 0.0 }
 0x8a2   : > { %1815 = vadd.xlane.f32.xlu0 %v1814_v56 }
 0x92b   : > { %v1813_v62 = vpop.xlane.xlu0 %1812 }
 0x92c   : > { %v1817_v63 = vmul.f32 0.03125, %v1813_v62 }
 0x92e   : > { %v1819_v1 = vadd.f32 1e-06, %v1817_v63 }
 0x92f   : > { %v1816_v2 = vpop.xlane.xlu0 %1815 }
 0x930   : > { %2740 = vrsqrt.f32 %v1819_v1  ;;  %v1818_v3 = vmul.f32 0.03125, %v1816_v2 }
 0x932   : > { %v1820_v4 = vadd.f32 1e-06, %v1818_v3 }
 0x934   : > { %2742 = vrsqrt.f32 %v1820_v4 }
 0x93a   : > { %v2741_v5 = vpop.eup %2740 }
 0x93b   : > { %v1823_v6 = vmul.f32 %v2741_v5, %v1807_v38 }
 0x93d   : > { %v1832_v13 = vmul.f32 %v2321_v8, %v1823_v6 }
 0x93e   : > { %v2743_v11 = vpop.eup %2742 }
 0x93f   : > { %v1824_v14 = vmul.f32 %v2743_v11, %v1808_v46  ;;  %v1841_v36 = vadd.f32 %v2322_v15, %v1832_v13 }
 0x941   : > { %v1833_v16 = vmul.f32 %v2321_v8, %v1824_v14 }
 0x943   : > { %v1842_v34 = vadd.f32 %v2322_v15, %v1833_v16 }
 0x945   : > { %v1843_v37 = vpack.c.bf16 %v1842_v34, %v1841_v36 }
 0x947   : > { %2456 = vmatmul.mubr.msk.bf16.vlgmr.msra.gmra.mrb[24].mxu1 %vm744_vm1, %v1843_v37 }
 0xa1a   : > { %v1904_v45 = vpop.f32.mrb[24].mxu1 }
 0xa1b   : > { %v1905_v47 = vadd.f32 %v2323_v43, %v1904_v45  ;;  %v2457_v48 = vpop.f32.mrb[25].mxu1 }
 0xa1c   : > { %v1907_v49 = vpop.f32.mrb[26].mxu1 }
 0xa1d   : > { %v1913_v53 = vmul.f32 0.70710677, %v1905_v47  ;;  %v1908_v51 = vadd.f32 %v2323_v43, %v1907_v49  ;;  %v2458_v54 = vpop.f32.mrb[27].mxu1  ;;  %v1911_v7 = vmul.f32 0.5, %v1905_v47 }
 0xa1f   : > { %2744 = verf.f32 %v1913_v53  ;;  %v1914_v57 = vmul.f32 0.70710677, %v1908_v51  ;;  %v1912_v0 = vmul.f32 0.5, %v1908_v51 }
 0xa21   : > { %2746 = verf.f32 %v1914_v57 }
 0xa29   : > { %v2745_v58 = vpop.eup %2744 }
 0xa2a   : > { %v1917_v59 = vadd.f32 1.0, %v2745_v58 }
 0xa2b   : > { %v2747_v24 = vpop.eup %2746 }
 0xa2c   : > { %v1918_v17 = vadd.f32 1.0, %v2747_v24  ;;  %v1919_v18 = vmul.f32 %v1917_v59, %v1911_v7 }
 0xa2e   : > { %v1920_v19 = vmul.f32 %v1918_v17, %v1912_v0 }
 0xa30   : > { %v1921_v20 = vpack.c.bf16 %v1920_v19, %v1919_v18 }
 0xa32   : > { %2468 = vmatmul.mubr.msk.bf16.vlgmr.msra.gmra.mrb[20].mxu0 %vm1961_vm6, %v1921_v20 }
 0xb05   : > { %v1999_v29 = vpop.f32.mrb[20].mxu0 }
 0xb06   : > { %v2000_v31 = vadd.f32 %v2327_v26, %v1999_v29  ;;  %v2469_v22 = vpop.f32.mrb[21].mxu0 }
 0xb07   : > { %v2002_v10 = vpop.f32.mrb[22].mxu0 }
 0xb08   : > { %v2006_v25 = vadd.f32 %v2000_v31, %v4116_v28  ;;  %v2003_v32 = vadd.f32 %v2327_v26, %v2002_v10  ;;  %v2470_v33 = vpop.f32.mrb[23].mxu0 }
 0xb0a   : > { %2008 = vst.msk [vmem:[%s704_s23] sm:$0xff] %vm744_vm1, %v2006_v25  ;;  %v2007_v52 = vadd.f32 %v2003_v32, %v4118_v9 }
 0xb0c   : > { %2009 = vst.msk [vmem:[%s704_s23 + $0x8] sm:$0xff] %vm744_vm1, %v2007_v52 }
 0xb0d   : > { %3131 = shalt.err (!%p3128_p4)
}
 0xb0e   : > { %s3132_s15 = scalar_lea.hbm %s4139_s2, 256  ;;  %s3136_s21 = scalar_lea.hbm %s4299_s9, 512 }
 0xb0f   : > { %p3133_p7 = scmp.ne.s32.totalorder %s4139_s2, %s3132_s15  ;;  %p3137_p5 = scmp.lt.u32.totalorder %s4139_s2, %s4299_s9 }
 0xb10   : > { %p3138_p12 = scmp.lt.u32.totalorder %s3136_s21, %s3132_s15  ;;  %p3140_p9 = scmp.lt.u32.totalorder %s3132_s15, %s4139_s2 }
 0xb11   : > { %p3134_p8 = pnand %p3133_p7, %p4300_p10 }
 0xb12   : > { %p3139_p1 = por %p3138_p12, %p3137_p5 }
 0xb13   : > { %p3135_p3 = pneg %p3134_p8 }
 0xb14   : > { %p3141_p6 = por %p3140_p9, %p3139_p1 }
 0xb16   : > { %p3142_p0 = pnand %p3141_p6, %p3135_p3 }
 0xb18   : > { %3145 = shalt.err (!%p3142_p0)
}
 0xb19   : > { %s3256_s7 = smov 128  }
 0xb1a   : > { %2517 = dma.vmem_to_hbm [thread:$0]  (%p4300_p10), %s4143_s3, 256, %s4139_s2, %s2011_s11, %s3256_s7, %s3256_s7, %s3252_s28  }
 0xb1b PF: > { %s4301_s18 = sld [smem:[#allocation44_spill]]  ;;  %s4302_s22 = sld [smem:[#allocation40_spill]] }
 0xb1c   : > { %s2041_s23 = sand.u32 1, %s3204_s25  }
 0xb1d   : > { %s2042_s10 = scalar_lea.sflag [#allocation10], %s2041_s23 }
 0xb21   : > { %p4303_p2 = scmp.ne.s32.totalorder %s4301_s18, 0  ;;  %p4304_p11 = scmp.ge.s32.totalorder %s4302_s22, 2 }
 0xb23   : > { %p2561_p13 = pnand %p4304_p11, %p4303_p2 }
 0xb25   : > { %3199 = dma.done.wait (!%p2561_p13), %s2042_s10, 256  }
 0xb26   : > { %3201 = vsyncadd (!%p2561_p13), %s2042_s10, 4294967040  ;;  %s37_s30 = sadd.s32 1, %s4302_s22   ;;  %s4305_s17 = sld [smem:[#allocation43_spill]] }
 0xb27   : > { %p34_p4 = scmp.ge.s32.totalorder %s37_s30, 4   ;;  %s4306_s28 = sld [smem:[#allocation39_spill]] }
 0xb28   : > { %s4307_s29 = sld [smem:[#allocation42_spill]]  ;;  %s4308_s25 = smov %s3208_s26 }
 0xb29   : > { %s4309_s26 = smov %s3212_s27  ;;  %36 = sbr.rel (!%p34_p4) target bundleno = 26 (0x1a), region = 204 }
 0xb2c   : > { %s4310_s27 = smov %s4305_s17 }
 0xb30   :  { %2047 = vsyncpa [#allocation9], 1 }
 0xb31   :  { %2049 = vsyncpa [#allocation9 + $0x1], 1 }
 0xb32   :  { %2050 = vsyncpa [#allocation12], 1 }
 0xb33   :  { %2052 = vsyncpa [#allocation12 + $0x1], 1 }
 0xb34   :  { %2053 = vsyncpa [#allocation15], 1 }
 0xb35   :  { %2054 = vsyncpa [#allocation18], 1 }
 0xb36   :  { %2055 = vsyncpa [#allocation21], 1 }
 0xb37   :  { %2056 = vsyncpa [#allocation24], 1 }
 0xb38   :  { %2057 = vsyncpa [#allocation27], 1 }
 0xb39   :  { %2058 = vsyncpa [#allocation10], 1 }
 0xb3a   :  { %2060 = vsyncpa [#allocation10 + $0x1], 1 }

</bundles_post_ra>
